<compile_context>
chip_gen: v7x
topology: tpu7x:2x2x1
jax: 0.10.0
libtpu: 0.0.40
codegen_flags: <defaults>
</compile_context>

<pallas_src>
from functools import partial

import jax
import jax.numpy as jnp
from jax.experimental import pallas as pl
from jax.experimental.pallas import tpu as pltpu


def _round_up(n, m):
    return ((n + m - 1) // m) * m


# ----------------------------------------------------------------------------
# Fused kernel: 5x [Conv1d(k=3,p=1) + folded-BN/bias + ReLU] + GAP + Linear
# ----------------------------------------------------------------------------
def make_fused_kernel(n_layers):
    def kernel(*refs):
        # refs layout:
        #   x_ref                    (B_TILE, L, C1)   f32, channels padded to C1
        #   w_refs[i]  i<n_layers    (3, Cin_i, Cout_i) bf16 per-tap conv weights
        #   ss_refs[i] i<n_layers    (2, Cout_i)        f32  [scale; shift] (BN+bias folded)
        #   pw_ref                   (C_last, NCP)      bf16 projection weight (lane-padded)
        #   pb_ref                   (1, NCP)           f32  projection bias
        #   o_ref                    (1, B_TILE, NCP)   f32  logits
        x_ref = refs[0]
        w_refs = refs[1:1 + n_layers]
        ss_refs = refs[1 + n_layers:1 + 2 * n_layers]
        pw_ref, pb_ref, o_ref = refs[1 + 2 * n_layers:]

        bt, L, c1 = x_ref.shape
        M = bt * L

        # Per-sample boundary masks for the 3-tap conv (hoisted, reused by all layers).
        # Row i holds sample i//L, time i%L; taps must not cross sample boundaries.
        pos = jax.lax.broadcasted_iota(jnp.int32, (M, 1), 0) % L
        has_left = pos >= 1          # x[t-1] exists
        has_right = pos < (L - 1)    # x[t+1] exists

        h = x_ref[...].reshape(M, c1)                       # (M, C) f32 activation
        for li in range(n_layers):                          # static unroll (5 layers)
            w = w_refs[li]                                  # (3, Cin, Cout) bf16
            # Shifted taps via XLU roll (non-negative shifts only), zeroed across
            # sample boundaries.  Kept f32 for the roll/select (v5e-safe); cast to
            # bf16 only as MXU operands.
            left = jnp.where(has_left, pltpu.roll(h, shift=1, axis=0), 0.0)
            right = jnp.where(has_right, pltpu.roll(h, shift=M - 1, axis=0), 0.0)
            acc = jnp.dot(h.astype(jnp.bfloat16), w[1],
                          preferred_element_type=jnp.float32)          # center tap
            acc = acc + jnp.dot(left.astype(jnp.bfloat16), w[0],
                                preferred_element_type=jnp.float32)    # x[t-1] tap
            acc = acc + jnp.dot(right.astype(jnp.bfloat16), w[2],
                                preferred_element_type=jnp.float32)    # x[t+1] tap
            ss = ss_refs[li][...]                           # (2, Cout) f32
            h = jnp.maximum(acc * ss[0:1, :] + ss[1:2, :], 0.0)  # BN/bias + ReLU

        # Global average pool over time + Linear(256 -> num_class), lane-padded.
        c_last = h.shape[-1]
        gap = jnp.mean(h.reshape(bt, L, c_last), axis=1)    # (B_TILE, C_last) f32
        logits = jnp.dot(gap.astype(jnp.bfloat16), pw_ref[...],
                         preferred_element_type=jnp.float32) + pb_ref[...]
        o_ref[0] = logits

    return kernel


def _pick_b_tile(B, L, target_rows=512):
    """Largest divisor of B with B_TILE*L <= target_rows (big M for the MXU);
    fall back to >=2 grid steps (v7x has 2 TensorCores) if that keeps >=128 rows."""
    best = 1
    for d in range(1, B + 1):
        if B % d == 0 and d * L <= target_rows:
            best = d
    if B // best < 2:
        for d in range(best, 0, -1):
            if B % d == 0 and B // d >= 2 and d * L >= 128:
                return d
    return best


# ----------------------------------------------------------------------------
# Forward wrapper (single pallas_call per forward)
# ----------------------------------------------------------------------------
@partial(jax.jit, static_argnums=(2,))
def model_forward(params, x_enc, num_class):
    Ws, SSs, PW, PB = params["Ws"], params["SSs"], params["PW"], params["PB"]
    n_layers = len(Ws)
    B, L, enc_in = x_enc.shape
    C1 = Ws[0].shape[1]              # layer-1 contraction width (128)
    NCP = PW.shape[1]                # lane-padded class count
    assert enc_in <= C1

    b_tile = _pick_b_tile(B, L)
    n_bt = B // b_tile

    # Pad input channels only to layer-1's true contraction width (tiny pad, f32).
    xp = jnp.pad(x_enc, ((0, 0), (0, 0), (0, C1 - enc_in)))

    in_specs = [pl.BlockSpec((b_tile, L, C1), lambda b: (b, 0, 0))]
    for W in Ws:                      # whole-array, grid-invariant (stay resident)
        in_specs.append(pl.BlockSpec(W.shape, lambda b: (0, 0, 0)))
    for S in SSs:
        in_specs.append(pl.BlockSpec(S.shape, lambda b: (0, 0)))
    in_specs.append(pl.BlockSpec(PW.shape, lambda b: (0, 0)))
    in_specs.append(pl.BlockSpec(PB.shape, lambda b: (0, 0)))

    out = pl.pallas_call(
        make_fused_kernel(n_layers),
        out_shape=jax.ShapeDtypeStruct((n_bt, b_tile, NCP), jnp.float32),
        grid=(n_bt,),
        in_specs=in_specs,
        out_specs=pl.BlockSpec((1, b_tile, NCP), lambda b: (b, 0, 0)),
        compiler_params=pltpu.CompilerParams(
            dimension_semantics=("parallel",)),
    )(xp, *Ws, *SSs, PW, PB)

    return out.reshape(B, NCP)[:, :num_class]                 # (B, num_class)


# ----------------------------------------------------------------------------
# Deterministic parameters in PyTorch layout + packing into kernel layout
# ----------------------------------------------------------------------------
def make_raw_params(key, enc_in, num_class, eps=1e-5):
    keys = iter(jax.random.split(key, 32))

    def conv(cin, cout, with_bn):
        # PyTorch Conv1d weight layout: (Cout, Cin, K).
        w = jax.random.normal(next(keys), (cout, cin, 3), jnp.float32) / jnp.sqrt(3.0 * cin)
        b = 0.1 * jax.random.normal(next(keys), (cout,), jnp.float32)
        bn = None
        if with_bn:
            bn = (0.5 + jax.random.uniform(next(keys), (cout,), jnp.float32),   # gamma
                  0.1 * jax.random.normal(next(keys), (cout,), jnp.float32),    # beta
                  0.1 * jax.random.normal(next(keys), (cout,), jnp.float32),    # running_mean
                  0.5 + jax.random.uniform(next(keys), (cout,), jnp.float32))   # running_var
        return (w, b, bn)

    convs = [
        conv(enc_in, 64, True),     # layer1
        conv(64, 128, True),        # layer2
        conv(128, 256, True),       # layer21
        conv(256, 256, True),       # layer22
        conv(256, 256, False),      # layer3 (Conv + ReLU, no BN)
        # layer23 exists in __init__ but is never used in ConvNet.forward — omitted.
    ]
    proj_w = jax.random.normal(next(keys), (256, num_class), jnp.float32) / jnp.sqrt(256.0)
    proj_b = 0.1 * jax.random.normal(next(keys), (num_class,), jnp.float32)
    return {"convs": convs, "proj_w": proj_w, "proj_b": proj_b, "eps": eps}


def pack_params(raw):
    """Pack PyTorch-layout weights into per-layer, lane-padded kernel tensors."""
    eps = raw["eps"]
    Ws, SSs = [], []
    for (w, b, bn) in raw["convs"]:
        cout, cin, K = w.shape
        cin_p, cout_p = _round_up(cin, 128), _round_up(cout, 128)
        # (Cout, Cin, K) -> (K, Cin, Cout); tap k=0 ↔ x[t-1] (cross-correlation).
        wt = jnp.transpose(w, (2, 1, 0))
        Wp = jnp.zeros((K, cin_p, cout_p), jnp.float32).at[:, :cin, :cout].set(wt)
        if bn is not None:
            gamma, beta, rmean, rvar = bn
            scale = gamma / jnp.sqrt(rvar + eps)          # inference-mode BN fold
            shift = beta + scale * (b - rmean)
        else:
            scale = jnp.ones((cout,), jnp.float32)
            shift = b
        ss = jnp.zeros((2, cout_p), jnp.float32)
        ss = ss.at[0, :cout].set(scale).at[1, :cout].set(shift)
        Ws.append(Wp.astype(jnp.bfloat16))
        SSs.append(ss)

    c_last, nc = raw["proj_w"].shape
    ncp = _round_up(max(nc, 128), 128)
    PW = jnp.zeros((c_last, ncp), jnp.float32).at[:, :nc].set(raw["proj_w"])
    PB = jnp.zeros((1, ncp), jnp.float32).at[0, :nc].set(raw["proj_b"])
    return {"Ws": tuple(Ws), "SSs": tuple(SSs),
            "PW": PW.astype(jnp.bfloat16), "PB": PB}


# ----------------------------------------------------------------------------
# Pure-JAX reference (matches the PyTorch classification forward)
# ----------------------------------------------------------------------------
def reference_forward(raw, x_enc):
    eps = raw["eps"]
    h = jnp.transpose(x_enc, (0, 2, 1))                       # (B, C, L)
    for (w, b, bn) in raw["convs"]:
        h = jax.lax.conv_general_dilated(
            h, w, window_strides=(1,), padding=((1, 1),),
            dimension_numbers=("NCH", "OIH", "NCH"))
        h = h + b[None, :, None]
        if bn is not None:
            gamma, beta, rmean, rvar = bn
            h = (h - rmean[None, :, None]) / jnp.sqrt(rvar[None, :, None] + eps)
            h = gamma[None, :, None] * h + beta[None, :, None]
        h = jnp.maximum(h, 0.0)
    gap = jnp.mean(h, axis=2)                                  # (B, 256)
    return gap @ raw["proj_w"] + raw["proj_b"]


# TODO(synk): the anomaly_detection / forecasting branches of Model.forward are not
# implemented; only the classification path (GAP + Linear) is fused here.

if __name__ == "__main__":
    B, SEQ_LEN, ENC_IN, NUM_CLASS = 2, 16, 4, 8

    key = jax.random.PRNGKey(0)
    k_params, k_x = jax.random.split(key)
    raw = make_raw_params(k_params, ENC_IN, NUM_CLASS)
    params = pack_params(raw)
    x_enc = jax.random.normal(k_x, (B, SEQ_LEN, ENC_IN), jnp.float32)

    out = model_forward(params, x_enc, NUM_CLASS)
    out = jax.block_until_ready(out)
    assert out.shape == (B, NUM_CLASS), out.shape
    assert bool(jnp.all(jnp.isfinite(out)))

    ref = reference_forward(raw, x_enc)
    assert bool(jnp.allclose(out, ref, rtol=5e-2, atol=5e-2)), (
        float(jnp.max(jnp.abs(out - ref))))
    print("KERNEL_OK")
</pallas_src>

<mosaic_0001>
module attributes {stable_mosaic.version = 11 : i64} {
  func.func @kernel(%arg0: i32, %arg1: memref<2x16x128xf32, #tpu.memory_space<vmem>>, %arg2: memref<3x128x128xbf16, #tpu.memory_space<vmem>>, %arg3: memref<3x128x128xbf16, #tpu.memory_space<vmem>>, %arg4: memref<3x128x256xbf16, #tpu.memory_space<vmem>>, %arg5: memref<3x256x256xbf16, #tpu.memory_space<vmem>>, %arg6: memref<3x256x256xbf16, #tpu.memory_space<vmem>>, %arg7: memref<2x128xf32, #tpu.memory_space<vmem>>, %arg8: memref<2x128xf32, #tpu.memory_space<vmem>>, %arg9: memref<2x256xf32, #tpu.memory_space<vmem>>, %arg10: memref<2x256xf32, #tpu.memory_space<vmem>>, %arg11: memref<2x256xf32, #tpu.memory_space<vmem>>, %arg12: memref<256x128xbf16, #tpu.memory_space<vmem>>, %arg13: memref<1x128xf32, #tpu.memory_space<vmem>>, %arg14: memref<1x2x128xf32, #tpu.memory_space<vmem>>) attributes {dimension_semantics = [#tpu.dimension_semantics<parallel>], iteration_bounds = array<i64: 1>, scalar_prefetch = 0 : i64, scratch_operands = 0 : i64, tpu.core_type = #tpu.core_type<tc>, window_params = [{transform_indices = @transform_0, window_bounds = array<i64: 2, 16, 128>}, {pipeline_mode = #tpu.pipeline_mode<synchronous>, transform_indices = @transform_1, window_bounds = array<i64: 3, 128, 128>}, {pipeline_mode = #tpu.pipeline_mode<synchronous>, transform_indices = @transform_2, window_bounds = array<i64: 3, 128, 128>}, {pipeline_mode = #tpu.pipeline_mode<synchronous>, transform_indices = @transform_3, window_bounds = array<i64: 3, 128, 256>}, {pipeline_mode = #tpu.pipeline_mode<synchronous>, transform_indices = @transform_4, window_bounds = array<i64: 3, 256, 256>}, {pipeline_mode = #tpu.pipeline_mode<synchronous>, transform_indices = @transform_5, window_bounds = array<i64: 3, 256, 256>}, {pipeline_mode = #tpu.pipeline_mode<synchronous>, transform_indices = @transform_6, window_bounds = array<i64: 2, 128>}, {pipeline_mode = #tpu.pipeline_mode<synchronous>, transform_indices = @transform_7, window_bounds = array<i64: 2, 128>}, {pipeline_mode = #tpu.pipeline_mode<synchronous>, transform_indices = @transform_8, window_bounds = array<i64: 2, 256>}, {pipeline_mode = #tpu.pipeline_mode<synchronous>, transform_indices = @transform_9, window_bounds = array<i64: 2, 256>}, {pipeline_mode = #tpu.pipeline_mode<synchronous>, transform_indices = @transform_10, window_bounds = array<i64: 2, 256>}, {pipeline_mode = #tpu.pipeline_mode<synchronous>, transform_indices = @transform_11, window_bounds = array<i64: 256, 128>}, {pipeline_mode = #tpu.pipeline_mode<synchronous>, transform_indices = @transform_12, window_bounds = array<i64: 1, 128>}, {transform_indices = @transform_13, window_bounds = array<i64: 1, 2, 128>}]} {
    %0 = tpu.iota {dimensions = array<i32: 0>} : vector<32x1xi32>
    %c16_i32 = arith.constant 16 : i32
    %c0_i32 = arith.constant 0 : i32
    %1 = arith.cmpi eq, %c16_i32, %c0_i32 : i32
    %c1_i32 = arith.constant 1 : i32
    %2 = arith.select %1, %c1_i32, %c16_i32 : i32
    %3 = vector.broadcast %2 : i32 to vector<32x1xi32>
    %4 = arith.remsi %0, %3 : vector<32x1xi32>
    %c0_i32_0 = arith.constant 0 : i32
    %5 = vector.broadcast %c0_i32_0 : i32 to vector<32x1xi32>
    %6 = arith.cmpi ne, %4, %5 : vector<32x1xi32>
    %c0_i32_1 = arith.constant 0 : i32
    %7 = vector.broadcast %c0_i32_1 : i32 to vector<32x1xi32>
    %8 = arith.cmpi slt, %4, %7 : vector<32x1xi32>
    %c0_i32_2 = arith.constant 0 : i32
    %9 = arith.cmpi slt, %2, %c0_i32_2 : i32
    %10 = vector.broadcast %9 : i1 to vector<32x1xi1>
    %11 = vector.broadcast %10 : vector<32x1xi1> to vector<32x1xi1>
    %12 = arith.xori %8, %11 : vector<32x1xi1>
    %13 = arith.andi %12, %6 : vector<32x1xi1>
    %14 = vector.broadcast %2 : i32 to vector<32x1xi32>
    %15 = arith.addi %4, %14 : vector<32x1xi32>
    %16 = arith.select %13, %15, %4 : vector<32x1xi1>, vector<32x1xi32>
    %c1_i32_3 = arith.constant 1 : i32
    %17 = vector.broadcast %c1_i32_3 : i32 to vector<32x1xi32>
    %18 = arith.cmpi sge, %16, %17 : vector<32x1xi32>
    %c15_i32 = arith.constant 15 : i32
    %19 = vector.broadcast %c15_i32 : i32 to vector<32x1xi32>
    %20 = arith.cmpi slt, %16, %19 : vector<32x1xi32>
    %c0 = arith.constant 0 : index
    %c0_4 = arith.constant 0 : index
    %c0_5 = arith.constant 0 : index
    %21 = vector.load %arg1[%c0, %c0_4, %c0_5] : memref<2x16x128xf32, #tpu.memory_space<vmem>>, vector<2x16x128xf32>
    %22 = vector.shape_cast %21 : vector<2x16x128xf32> to vector<32x128xf32>
    %c1_i32_6 = arith.constant 1 : i32
    %23 = tpu.dynamic_rotate %22 by %c1_i32_6 dim 0 : vector<32x128xf32>, i32 -> vector<32x128xf32>
    %cst = arith.constant 0.000000e+00 : f32
    %24 = vector.shape_cast %18 : vector<32x1xi1> to vector<32x1xi1>
    %25 = vector.broadcast %24 : vector<32x1xi1> to vector<32x128xi1>
    %26 = vector.broadcast %cst : f32 to vector<32x128xf32>
    %27 = arith.select %25, %23, %26 : vector<32x128xi1>, vector<32x128xf32>
    %c31_i32 = arith.constant 31 : i32
    %28 = tpu.dynamic_rotate %22 by %c31_i32 dim 0 : vector<32x128xf32>, i32 -> vector<32x128xf32>
    %cst_7 = arith.constant 0.000000e+00 : f32
    %29 = vector.shape_cast %20 : vector<32x1xi1> to vector<32x1xi1>
    %30 = vector.broadcast %29 : vector<32x1xi1> to vector<32x128xi1>
    %31 = vector.broadcast %cst_7 : f32 to vector<32x128xf32>
    %32 = arith.select %30, %28, %31 : vector<32x128xi1>, vector<32x128xf32>
    %33 = arith.truncf %22 : vector<32x128xf32> to vector<32x128xbf16>
    %c1 = arith.constant 1 : index
    %c0_8 = arith.constant 0 : index
    %c0_9 = arith.constant 0 : index
    %34 = vector.load %arg2[%c1, %c0_8, %c0_9] : memref<3x128x128xbf16, #tpu.memory_space<vmem>>, vector<1x128x128xbf16>
    %35 = vector.shape_cast %34 : vector<1x128x128xbf16> to vector<128x128xbf16>
    %cst_10 = arith.constant dense<0.000000e+00> : vector<32x128xf32>
    %36 = tpu.matmul %33, %35, %cst_10 {dimension_numbers = #tpu.dot_dimension_numbers<[1], [0], [0], [1], [0, 0, 1, 1], [], []>} : vector<32x128xbf16>, vector<128x128xbf16>, vector<32x128xf32> -> vector<32x128xf32>
    %37 = arith.truncf %27 : vector<32x128xf32> to vector<32x128xbf16>
    %c0_11 = arith.constant 0 : index
    %c0_12 = arith.constant 0 : index
    %c0_13 = arith.constant 0 : index
    %38 = vector.load %arg2[%c0_11, %c0_12, %c0_13] : memref<3x128x128xbf16, #tpu.memory_space<vmem>>, vector<1x128x128xbf16>
    %39 = vector.shape_cast %38 : vector<1x128x128xbf16> to vector<128x128xbf16>
    %cst_14 = arith.constant dense<0.000000e+00> : vector<32x128xf32>
    %40 = tpu.matmul %37, %39, %cst_14 {dimension_numbers = #tpu.dot_dimension_numbers<[1], [0], [0], [1], [0, 0, 1, 1], [], []>} : vector<32x128xbf16>, vector<128x128xbf16>, vector<32x128xf32> -> vector<32x128xf32>
    %41 = arith.addf %36, %40 : vector<32x128xf32>
    %42 = arith.truncf %32 : vector<32x128xf32> to vector<32x128xbf16>
    %c2 = arith.constant 2 : index
    %c0_15 = arith.constant 0 : index
    %c0_16 = arith.constant 0 : index
    %43 = vector.load %arg2[%c2, %c0_15, %c0_16] : memref<3x128x128xbf16, #tpu.memory_space<vmem>>, vector<1x128x128xbf16>
    %44 = vector.shape_cast %43 : vector<1x128x128xbf16> to vector<128x128xbf16>
    %cst_17 = arith.constant dense<0.000000e+00> : vector<32x128xf32>
    %45 = tpu.matmul %42, %44, %cst_17 {dimension_numbers = #tpu.dot_dimension_numbers<[1], [0], [0], [1], [0, 0, 1, 1], [], []>} : vector<32x128xbf16>, vector<128x128xbf16>, vector<32x128xf32> -> vector<32x128xf32>
    %46 = arith.addf %41, %45 : vector<32x128xf32>
    %c0_18 = arith.constant 0 : index
    %c0_19 = arith.constant 0 : index
    %47 = vector.load %arg7[%c0_18, %c0_19] : memref<2x128xf32, #tpu.memory_space<vmem>>, vector<2x128xf32>
    %48 = vector.extract_strided_slice %47 {offsets = [0, 0], sizes = [1, 128], strides = [1, 1]} : vector<2x128xf32> to vector<1x128xf32>
    %49 = vector.broadcast %48 : vector<1x128xf32> to vector<32x128xf32>
    %50 = arith.mulf %46, %49 : vector<32x128xf32>
    %51 = vector.extract_strided_slice %47 {offsets = [1, 0], sizes = [1, 128], strides = [1, 1]} : vector<2x128xf32> to vector<1x128xf32>
    %52 = vector.broadcast %51 : vector<1x128xf32> to vector<32x128xf32>
    %53 = arith.addf %50, %52 : vector<32x128xf32>
    %cst_20 = arith.constant 0.000000e+00 : f32
    %54 = vector.broadcast %cst_20 : f32 to vector<32x128xf32>
    %55 = arith.maximumf %53, %54 : vector<32x128xf32>
    %c1_i32_21 = arith.constant 1 : i32
    %56 = tpu.dynamic_rotate %55 by %c1_i32_21 dim 0 : vector<32x128xf32>, i32 -> vector<32x128xf32>
    %cst_22 = arith.constant 0.000000e+00 : f32
    %57 = vector.shape_cast %18 : vector<32x1xi1> to vector<32x1xi1>
    %58 = vector.broadcast %57 : vector<32x1xi1> to vector<32x128xi1>
    %59 = vector.broadcast %cst_22 : f32 to vector<32x128xf32>
    %60 = arith.select %58, %56, %59 : vector<32x128xi1>, vector<32x128xf32>
    %c31_i32_23 = arith.constant 31 : i32
    %61 = tpu.dynamic_rotate %55 by %c31_i32_23 dim 0 : vector<32x128xf32>, i32 -> vector<32x128xf32>
    %cst_24 = arith.constant 0.000000e+00 : f32
    %62 = vector.shape_cast %20 : vector<32x1xi1> to vector<32x1xi1>
    %63 = vector.broadcast %62 : vector<32x1xi1> to vector<32x128xi1>
    %64 = vector.broadcast %cst_24 : f32 to vector<32x128xf32>
    %65 = arith.select %63, %61, %64 : vector<32x128xi1>, vector<32x128xf32>
    %66 = arith.truncf %55 : vector<32x128xf32> to vector<32x128xbf16>
    %c1_25 = arith.constant 1 : index
    %c0_26 = arith.constant 0 : index
    %c0_27 = arith.constant 0 : index
    %67 = vector.load %arg3[%c1_25, %c0_26, %c0_27] : memref<3x128x128xbf16, #tpu.memory_space<vmem>>, vector<1x128x128xbf16>
    %68 = vector.shape_cast %67 : vector<1x128x128xbf16> to vector<128x128xbf16>
    %cst_28 = arith.constant dense<0.000000e+00> : vector<32x128xf32>
    %69 = tpu.matmul %66, %68, %cst_28 {dimension_numbers = #tpu.dot_dimension_numbers<[1], [0], [0], [1], [0, 0, 1, 1], [], []>} : vector<32x128xbf16>, vector<128x128xbf16>, vector<32x128xf32> -> vector<32x128xf32>
    %70 = arith.truncf %60 : vector<32x128xf32> to vector<32x128xbf16>
    %c0_29 = arith.constant 0 : index
    %c0_30 = arith.constant 0 : index
    %c0_31 = arith.constant 0 : index
    %71 = vector.load %arg3[%c0_29, %c0_30, %c0_31] : memref<3x128x128xbf16, #tpu.memory_space<vmem>>, vector<1x128x128xbf16>
    %72 = vector.shape_cast %71 : vector<1x128x128xbf16> to vector<128x128xbf16>
    %cst_32 = arith.constant dense<0.000000e+00> : vector<32x128xf32>
    %73 = tpu.matmul %70, %72, %cst_32 {dimension_numbers = #tpu.dot_dimension_numbers<[1], [0], [0], [1], [0, 0, 1, 1], [], []>} : vector<32x128xbf16>, vector<128x128xbf16>, vector<32x128xf32> -> vector<32x128xf32>
    %74 = arith.addf %69, %73 : vector<32x128xf32>
    %75 = arith.truncf %65 : vector<32x128xf32> to vector<32x128xbf16>
    %c2_33 = arith.constant 2 : index
    %c0_34 = arith.constant 0 : index
    %c0_35 = arith.constant 0 : index
    %76 = vector.load %arg3[%c2_33, %c0_34, %c0_35] : memref<3x128x128xbf16, #tpu.memory_space<vmem>>, vector<1x128x128xbf16>
    %77 = vector.shape_cast %76 : vector<1x128x128xbf16> to vector<128x128xbf16>
    %cst_36 = arith.constant dense<0.000000e+00> : vector<32x128xf32>
    %78 = tpu.matmul %75, %77, %cst_36 {dimension_numbers = #tpu.dot_dimension_numbers<[1], [0], [0], [1], [0, 0, 1, 1], [], []>} : vector<32x128xbf16>, vector<128x128xbf16>, vector<32x128xf32> -> vector<32x128xf32>
    %79 = arith.addf %74, %78 : vector<32x128xf32>
    %c0_37 = arith.constant 0 : index
    %c0_38 = arith.constant 0 : index
    %80 = vector.load %arg8[%c0_37, %c0_38] : memref<2x128xf32, #tpu.memory_space<vmem>>, vector<2x128xf32>
    %81 = vector.extract_strided_slice %80 {offsets = [0, 0], sizes = [1, 128], strides = [1, 1]} : vector<2x128xf32> to vector<1x128xf32>
    %82 = vector.broadcast %81 : vector<1x128xf32> to vector<32x128xf32>
    %83 = arith.mulf %79, %82 : vector<32x128xf32>
    %84 = vector.extract_strided_slice %80 {offsets = [1, 0], sizes = [1, 128], strides = [1, 1]} : vector<2x128xf32> to vector<1x128xf32>
    %85 = vector.broadcast %84 : vector<1x128xf32> to vector<32x128xf32>
    %86 = arith.addf %83, %85 : vector<32x128xf32>
    %cst_39 = arith.constant 0.000000e+00 : f32
    %87 = vector.broadcast %cst_39 : f32 to vector<32x128xf32>
    %88 = arith.maximumf %86, %87 : vector<32x128xf32>
    %c1_i32_40 = arith.constant 1 : i32
    %89 = tpu.dynamic_rotate %88 by %c1_i32_40 dim 0 : vector<32x128xf32>, i32 -> vector<32x128xf32>
    %cst_41 = arith.constant 0.000000e+00 : f32
    %90 = vector.shape_cast %18 : vector<32x1xi1> to vector<32x1xi1>
    %91 = vector.broadcast %90 : vector<32x1xi1> to vector<32x128xi1>
    %92 = vector.broadcast %cst_41 : f32 to vector<32x128xf32>
    %93 = arith.select %91, %89, %92 : vector<32x128xi1>, vector<32x128xf32>
    %c31_i32_42 = arith.constant 31 : i32
    %94 = tpu.dynamic_rotate %88 by %c31_i32_42 dim 0 : vector<32x128xf32>, i32 -> vector<32x128xf32>
    %cst_43 = arith.constant 0.000000e+00 : f32
    %95 = vector.shape_cast %20 : vector<32x1xi1> to vector<32x1xi1>
    %96 = vector.broadcast %95 : vector<32x1xi1> to vector<32x128xi1>
    %97 = vector.broadcast %cst_43 : f32 to vector<32x128xf32>
    %98 = arith.select %96, %94, %97 : vector<32x128xi1>, vector<32x128xf32>
    %99 = arith.truncf %88 : vector<32x128xf32> to vector<32x128xbf16>
    %c1_44 = arith.constant 1 : index
    %c0_45 = arith.constant 0 : index
    %c0_46 = arith.constant 0 : index
    %100 = vector.load %arg4[%c1_44, %c0_45, %c0_46] : memref<3x128x256xbf16, #tpu.memory_space<vmem>>, vector<1x128x256xbf16>
    %101 = vector.shape_cast %100 : vector<1x128x256xbf16> to vector<128x256xbf16>
    %cst_47 = arith.constant dense<0.000000e+00> : vector<32x256xf32>
    %102 = tpu.matmul %99, %101, %cst_47 {dimension_numbers = #tpu.dot_dimension_numbers<[1], [0], [0], [1], [0, 0, 1, 1], [], []>} : vector<32x128xbf16>, vector<128x256xbf16>, vector<32x256xf32> -> vector<32x256xf32>
    %103 = arith.truncf %93 : vector<32x128xf32> to vector<32x128xbf16>
    %c0_48 = arith.constant 0 : index
    %c0_49 = arith.constant 0 : index
    %c0_50 = arith.constant 0 : index
    %104 = vector.load %arg4[%c0_48, %c0_49, %c0_50] : memref<3x128x256xbf16, #tpu.memory_space<vmem>>, vector<1x128x256xbf16>
    %105 = vector.shape_cast %104 : vector<1x128x256xbf16> to vector<128x256xbf16>
    %cst_51 = arith.constant dense<0.000000e+00> : vector<32x256xf32>
    %106 = tpu.matmul %103, %105, %cst_51 {dimension_numbers = #tpu.dot_dimension_numbers<[1], [0], [0], [1], [0, 0, 1, 1], [], []>} : vector<32x128xbf16>, vector<128x256xbf16>, vector<32x256xf32> -> vector<32x256xf32>
    %107 = arith.addf %102, %106 : vector<32x256xf32>
    %108 = arith.truncf %98 : vector<32x128xf32> to vector<32x128xbf16>
    %c2_52 = arith.constant 2 : index
    %c0_53 = arith.constant 0 : index
    %c0_54 = arith.constant 0 : index
    %109 = vector.load %arg4[%c2_52, %c0_53, %c0_54] : memref<3x128x256xbf16, #tpu.memory_space<vmem>>, vector<1x128x256xbf16>
    %110 = vector.shape_cast %109 : vector<1x128x256xbf16> to vector<128x256xbf16>
    %cst_55 = arith.constant dense<0.000000e+00> : vector<32x256xf32>
    %111 = tpu.matmul %108, %110, %cst_55 {dimension_numbers = #tpu.dot_dimension_numbers<[1], [0], [0], [1], [0, 0, 1, 1], [], []>} : vector<32x128xbf16>, vector<128x256xbf16>, vector<32x256xf32> -> vector<32x256xf32>
    %112 = arith.addf %107, %111 : vector<32x256xf32>
    %c0_56 = arith.constant 0 : index
    %c0_57 = arith.constant 0 : index
    %113 = vector.load %arg9[%c0_56, %c0_57] : memref<2x256xf32, #tpu.memory_space<vmem>>, vector<2x256xf32>
    %114 = vector.extract_strided_slice %113 {offsets = [0, 0], sizes = [1, 256], strides = [1, 1]} : vector<2x256xf32> to vector<1x256xf32>
    %115 = vector.broadcast %114 : vector<1x256xf32> to vector<32x256xf32>
    %116 = arith.mulf %112, %115 : vector<32x256xf32>
    %117 = vector.extract_strided_slice %113 {offsets = [1, 0], sizes = [1, 256], strides = [1, 1]} : vector<2x256xf32> to vector<1x256xf32>
    %118 = vector.broadcast %117 : vector<1x256xf32> to vector<32x256xf32>
    %119 = arith.addf %116, %118 : vector<32x256xf32>
    %cst_58 = arith.constant 0.000000e+00 : f32
    %120 = vector.broadcast %cst_58 : f32 to vector<32x256xf32>
    %121 = arith.maximumf %119, %120 : vector<32x256xf32>
    %c1_i32_59 = arith.constant 1 : i32
    %122 = tpu.dynamic_rotate %121 by %c1_i32_59 dim 0 : vector<32x256xf32>, i32 -> vector<32x256xf32>
    %cst_60 = arith.constant 0.000000e+00 : f32
    %123 = vector.shape_cast %18 : vector<32x1xi1> to vector<32x1xi1>
    %124 = vector.broadcast %123 : vector<32x1xi1> to vector<32x256xi1>
    %125 = vector.broadcast %cst_60 : f32 to vector<32x256xf32>
    %126 = arith.select %124, %122, %125 : vector<32x256xi1>, vector<32x256xf32>
    %c31_i32_61 = arith.constant 31 : i32
    %127 = tpu.dynamic_rotate %121 by %c31_i32_61 dim 0 : vector<32x256xf32>, i32 -> vector<32x256xf32>
    %cst_62 = arith.constant 0.000000e+00 : f32
    %128 = vector.shape_cast %20 : vector<32x1xi1> to vector<32x1xi1>
    %129 = vector.broadcast %128 : vector<32x1xi1> to vector<32x256xi1>
    %130 = vector.broadcast %cst_62 : f32 to vector<32x256xf32>
    %131 = arith.select %129, %127, %130 : vector<32x256xi1>, vector<32x256xf32>
    %132 = arith.truncf %121 : vector<32x256xf32> to vector<32x256xbf16>
    %c1_63 = arith.constant 1 : index
    %c0_64 = arith.constant 0 : index
    %c0_65 = arith.constant 0 : index
    %133 = vector.load %arg5[%c1_63, %c0_64, %c0_65] : memref<3x256x256xbf16, #tpu.memory_space<vmem>>, vector<1x256x256xbf16>
    %134 = vector.shape_cast %133 : vector<1x256x256xbf16> to vector<256x256xbf16>
    %cst_66 = arith.constant dense<0.000000e+00> : vector<32x256xf32>
    %135 = tpu.matmul %132, %134, %cst_66 {dimension_numbers = #tpu.dot_dimension_numbers<[1], [0], [0], [1], [0, 0, 1, 1], [], []>} : vector<32x256xbf16>, vector<256x256xbf16>, vector<32x256xf32> -> vector<32x256xf32>
    %136 = arith.truncf %126 : vector<32x256xf32> to vector<32x256xbf16>
    %c0_67 = arith.constant 0 : index
    %c0_68 = arith.constant 0 : index
    %c0_69 = arith.constant 0 : index
    %137 = vector.load %arg5[%c0_67, %c0_68, %c0_69] : memref<3x256x256xbf16, #tpu.memory_space<vmem>>, vector<1x256x256xbf16>
    %138 = vector.shape_cast %137 : vector<1x256x256xbf16> to vector<256x256xbf16>
    %cst_70 = arith.constant dense<0.000000e+00> : vector<32x256xf32>
    %139 = tpu.matmul %136, %138, %cst_70 {dimension_numbers = #tpu.dot_dimension_numbers<[1], [0], [0], [1], [0, 0, 1, 1], [], []>} : vector<32x256xbf16>, vector<256x256xbf16>, vector<32x256xf32> -> vector<32x256xf32>
    %140 = arith.addf %135, %139 : vector<32x256xf32>
    %141 = arith.truncf %131 : vector<32x256xf32> to vector<32x256xbf16>
    %c2_71 = arith.constant 2 : index
    %c0_72 = arith.constant 0 : index
    %c0_73 = arith.constant 0 : index
    %142 = vector.load %arg5[%c2_71, %c0_72, %c0_73] : memref<3x256x256xbf16, #tpu.memory_space<vmem>>, vector<1x256x256xbf16>
    %143 = vector.shape_cast %142 : vector<1x256x256xbf16> to vector<256x256xbf16>
    %cst_74 = arith.constant dense<0.000000e+00> : vector<32x256xf32>
    %144 = tpu.matmul %141, %143, %cst_74 {dimension_numbers = #tpu.dot_dimension_numbers<[1], [0], [0], [1], [0, 0, 1, 1], [], []>} : vector<32x256xbf16>, vector<256x256xbf16>, vector<32x256xf32> -> vector<32x256xf32>
    %145 = arith.addf %140, %144 : vector<32x256xf32>
    %c0_75 = arith.constant 0 : index
    %c0_76 = arith.constant 0 : index
    %146 = vector.load %arg10[%c0_75, %c0_76] : memref<2x256xf32, #tpu.memory_space<vmem>>, vector<2x256xf32>
    %147 = vector.extract_strided_slice %146 {offsets = [0, 0], sizes = [1, 256], strides = [1, 1]} : vector<2x256xf32> to vector<1x256xf32>
    %148 = vector.broadcast %147 : vector<1x256xf32> to vector<32x256xf32>
    %149 = arith.mulf %145, %148 : vector<32x256xf32>
    %150 = vector.extract_strided_slice %146 {offsets = [1, 0], sizes = [1, 256], strides = [1, 1]} : vector<2x256xf32> to vector<1x256xf32>
    %151 = vector.broadcast %150 : vector<1x256xf32> to vector<32x256xf32>
    %152 = arith.addf %149, %151 : vector<32x256xf32>
    %cst_77 = arith.constant 0.000000e+00 : f32
    %153 = vector.broadcast %cst_77 : f32 to vector<32x256xf32>
    %154 = arith.maximumf %152, %153 : vector<32x256xf32>
    %c1_i32_78 = arith.constant 1 : i32
    %155 = tpu.dynamic_rotate %154 by %c1_i32_78 dim 0 : vector<32x256xf32>, i32 -> vector<32x256xf32>
    %cst_79 = arith.constant 0.000000e+00 : f32
    %156 = vector.shape_cast %18 : vector<32x1xi1> to vector<32x1xi1>
    %157 = vector.broadcast %156 : vector<32x1xi1> to vector<32x256xi1>
    %158 = vector.broadcast %cst_79 : f32 to vector<32x256xf32>
    %159 = arith.select %157, %155, %158 : vector<32x256xi1>, vector<32x256xf32>
    %c31_i32_80 = arith.constant 31 : i32
    %160 = tpu.dynamic_rotate %154 by %c31_i32_80 dim 0 : vector<32x256xf32>, i32 -> vector<32x256xf32>
    %cst_81 = arith.constant 0.000000e+00 : f32
    %161 = vector.shape_cast %20 : vector<32x1xi1> to vector<32x1xi1>
    %162 = vector.broadcast %161 : vector<32x1xi1> to vector<32x256xi1>
    %163 = vector.broadcast %cst_81 : f32 to vector<32x256xf32>
    %164 = arith.select %162, %160, %163 : vector<32x256xi1>, vector<32x256xf32>
    %165 = arith.truncf %154 : vector<32x256xf32> to vector<32x256xbf16>
    %c1_82 = arith.constant 1 : index
    %c0_83 = arith.constant 0 : index
    %c0_84 = arith.constant 0 : index
    %166 = vector.load %arg6[%c1_82, %c0_83, %c0_84] : memref<3x256x256xbf16, #tpu.memory_space<vmem>>, vector<1x256x256xbf16>
    %167 = vector.shape_cast %166 : vector<1x256x256xbf16> to vector<256x256xbf16>
    %cst_85 = arith.constant dense<0.000000e+00> : vector<32x256xf32>
    %168 = tpu.matmul %165, %167, %cst_85 {dimension_numbers = #tpu.dot_dimension_numbers<[1], [0], [0], [1], [0, 0, 1, 1], [], []>} : vector<32x256xbf16>, vector<256x256xbf16>, vector<32x256xf32> -> vector<32x256xf32>
    %169 = arith.truncf %159 : vector<32x256xf32> to vector<32x256xbf16>
    %c0_86 = arith.constant 0 : index
    %c0_87 = arith.constant 0 : index
    %c0_88 = arith.constant 0 : index
    %170 = vector.load %arg6[%c0_86, %c0_87, %c0_88] : memref<3x256x256xbf16, #tpu.memory_space<vmem>>, vector<1x256x256xbf16>
    %171 = vector.shape_cast %170 : vector<1x256x256xbf16> to vector<256x256xbf16>
    %cst_89 = arith.constant dense<0.000000e+00> : vector<32x256xf32>
    %172 = tpu.matmul %169, %171, %cst_89 {dimension_numbers = #tpu.dot_dimension_numbers<[1], [0], [0], [1], [0, 0, 1, 1], [], []>} : vector<32x256xbf16>, vector<256x256xbf16>, vector<32x256xf32> -> vector<32x256xf32>
    %173 = arith.addf %168, %172 : vector<32x256xf32>
    %174 = arith.truncf %164 : vector<32x256xf32> to vector<32x256xbf16>
    %c2_90 = arith.constant 2 : index
    %c0_91 = arith.constant 0 : index
    %c0_92 = arith.constant 0 : index
    %175 = vector.load %arg6[%c2_90, %c0_91, %c0_92] : memref<3x256x256xbf16, #tpu.memory_space<vmem>>, vector<1x256x256xbf16>
    %176 = vector.shape_cast %175 : vector<1x256x256xbf16> to vector<256x256xbf16>
    %cst_93 = arith.constant dense<0.000000e+00> : vector<32x256xf32>
    %177 = tpu.matmul %174, %176, %cst_93 {dimension_numbers = #tpu.dot_dimension_numbers<[1], [0], [0], [1], [0, 0, 1, 1], [], []>} : vector<32x256xbf16>, vector<256x256xbf16>, vector<32x256xf32> -> vector<32x256xf32>
    %178 = arith.addf %173, %177 : vector<32x256xf32>
    %c0_94 = arith.constant 0 : index
    %c0_95 = arith.constant 0 : index
    %179 = vector.load %arg11[%c0_94, %c0_95] : memref<2x256xf32, #tpu.memory_space<vmem>>, vector<2x256xf32>
    %180 = vector.extract_strided_slice %179 {offsets = [0, 0], sizes = [1, 256], strides = [1, 1]} : vector<2x256xf32> to vector<1x256xf32>
    %181 = vector.broadcast %180 : vector<1x256xf32> to vector<32x256xf32>
    %182 = arith.mulf %178, %181 : vector<32x256xf32>
    %183 = vector.extract_strided_slice %179 {offsets = [1, 0], sizes = [1, 256], strides = [1, 1]} : vector<2x256xf32> to vector<1x256xf32>
    %184 = vector.broadcast %183 : vector<1x256xf32> to vector<32x256xf32>
    %185 = arith.addf %182, %184 : vector<32x256xf32>
    %cst_96 = arith.constant 0.000000e+00 : f32
    %186 = vector.broadcast %cst_96 : f32 to vector<32x256xf32>
    %187 = arith.maximumf %185, %186 : vector<32x256xf32>
    %188 = vector.shape_cast %187 : vector<32x256xf32> to vector<2x16x256xf32>
    %cst_97 = arith.constant dense<0.000000e+00> : vector<2x256xf32>
    %189 = vector.multi_reduction <add>, %188, %cst_97 [1] : vector<2x16x256xf32> to vector<2x256xf32>
    %cst_98 = arith.constant 1.600000e+01 : f32
    %190 = vector.broadcast %cst_98 : f32 to vector<2x256xf32>
    %191 = arith.divf %189, %190 : vector<2x256xf32>
    %192 = arith.truncf %191 : vector<2x256xf32> to vector<2x256xbf16>
    %c0_99 = arith.constant 0 : index
    %c0_100 = arith.constant 0 : index
    %193 = vector.load %arg12[%c0_99, %c0_100] : memref<256x128xbf16, #tpu.memory_space<vmem>>, vector<256x128xbf16>
    %cst_101 = arith.constant dense<0.000000e+00> : vector<2x128xf32>
    %194 = tpu.matmul %192, %193, %cst_101 {dimension_numbers = #tpu.dot_dimension_numbers<[1], [0], [0], [1], [0, 0, 1, 1], [], []>} : vector<2x256xbf16>, vector<256x128xbf16>, vector<2x128xf32> -> vector<2x128xf32>
    %c0_102 = arith.constant 0 : index
    %c0_103 = arith.constant 0 : index
    %195 = vector.load %arg13[%c0_102, %c0_103] : memref<1x128xf32, #tpu.memory_space<vmem>>, vector<1x128xf32>
    %196 = vector.broadcast %195 : vector<1x128xf32> to vector<2x128xf32>
    %197 = arith.addf %194, %196 : vector<2x128xf32>
    %c0_104 = arith.constant 0 : index
    %c0_105 = arith.constant 0 : index
    %c0_106 = arith.constant 0 : index
    %198 = vector.load %arg14[%c0_104, %c0_105, %c0_106] : memref<1x2x128xf32, #tpu.memory_space<vmem>>, vector<1x2x128xf32>
    %199 = vector.shape_cast %198 : vector<1x2x128xf32> to vector<2x128xf32>
    %200 = vector.shape_cast %197 : vector<2x128xf32> to vector<1x2x128xf32>
    tpu.vector_store %arg14[%c0_104, %c0_105, %c0_106], %200 {strides = array<i32>} : memref<1x2x128xf32, #tpu.memory_space<vmem>>, vector<1x2x128xf32>,
    return
  }
  func.func @transform_0(%arg0: i32) -> (i32, i32, i32) {
    %c0_i32 = arith.constant 0 : i32
    %c0_i32_0 = arith.constant 0 : i32
    %c0_i32_1 = arith.constant 0 : i32
    return %arg0, %c0_i32, %c0_i32_0 : i32, i32, i32
  }
  func.func @transform_1(%arg0: i32) -> (i32, i32, i32) {
    %c0_i32 = arith.constant 0 : i32
    %c0_i32_0 = arith.constant 0 : i32
    %c0_i32_1 = arith.constant 0 : i32
    %c0_i32_2 = arith.constant 0 : i32
    return %c0_i32, %c0_i32_0, %c0_i32_1 : i32, i32, i32
  }
  func.func @transform_2(%arg0: i32) -> (i32, i32, i32) {
    %c0_i32 = arith.constant 0 : i32
    %c0_i32_0 = arith.constant 0 : i32
    %c0_i32_1 = arith.constant 0 : i32
    %c0_i32_2 = arith.constant 0 : i32
    return %c0_i32, %c0_i32_0, %c0_i32_1 : i32, i32, i32
  }
  func.func @transform_3(%arg0: i32) -> (i32, i32, i32) {
    %c0_i32 = arith.constant 0 : i32
    %c0_i32_0 = arith.constant 0 : i32
    %c0_i32_1 = arith.constant 0 : i32
    %c0_i32_2 = arith.constant 0 : i32
    return %c0_i32, %c0_i32_0, %c0_i32_1 : i32, i32, i32
  }
  func.func @transform_4(%arg0: i32) -> (i32, i32, i32) {
    %c0_i32 = arith.constant 0 : i32
    %c0_i32_0 = arith.constant 0 : i32
    %c0_i32_1 = arith.constant 0 : i32
    %c0_i32_2 = arith.constant 0 : i32
    return %c0_i32, %c0_i32_0, %c0_i32_1 : i32, i32, i32
  }
  func.func @transform_5(%arg0: i32) -> (i32, i32, i32) {
    %c0_i32 = arith.constant 0 : i32
    %c0_i32_0 = arith.constant 0 : i32
    %c0_i32_1 = arith.constant 0 : i32
    %c0_i32_2 = arith.constant 0 : i32
    return %c0_i32, %c0_i32_0, %c0_i32_1 : i32, i32, i32
  }
  func.func @transform_6(%arg0: i32) -> (i32, i32) {
    %c0_i32 = arith.constant 0 : i32
    %c0_i32_0 = arith.constant 0 : i32
    %c0_i32_1 = arith.constant 0 : i32
    return %c0_i32, %c0_i32_0 : i32, i32
  }
  func.func @transform_7(%arg0: i32) -> (i32, i32) {
    %c0_i32 = arith.constant 0 : i32
    %c0_i32_0 = arith.constant 0 : i32
    %c0_i32_1 = arith.constant 0 : i32
    return %c0_i32, %c0_i32_0 : i32, i32
  }
  func.func @transform_8(%arg0: i32) -> (i32, i32) {
    %c0_i32 = arith.constant 0 : i32
    %c0_i32_0 = arith.constant 0 : i32
    %c0_i32_1 = arith.constant 0 : i32
    return %c0_i32, %c0_i32_0 : i32, i32
  }
  func.func @transform_9(%arg0: i32) -> (i32, i32) {
    %c0_i32 = arith.constant 0 : i32
    %c0_i32_0 = arith.constant 0 : i32
    %c0_i32_1 = arith.constant 0 : i32
    return %c0_i32, %c0_i32_0 : i32, i32
  }
  func.func @transform_10(%arg0: i32) -> (i32, i32) {
    %c0_i32 = arith.constant 0 : i32
    %c0_i32_0 = arith.constant 0 : i32
    %c0_i32_1 = arith.constant 0 : i32
    return %c0_i32, %c0_i32_0 : i32, i32
  }
  func.func @transform_11(%arg0: i32) -> (i32, i32) {
    %c0_i32 = arith.constant 0 : i32
    %c0_i32_0 = arith.constant 0 : i32
    %c0_i32_1 = arith.constant 0 : i32
    return %c0_i32, %c0_i32_0 : i32, i32
  }
  func.func @transform_12(%arg0: i32) -> (i32, i32) {
    %c0_i32 = arith.constant 0 : i32
    %c0_i32_0 = arith.constant 0 : i32
    %c0_i32_1 = arith.constant 0 : i32
    return %c0_i32, %c0_i32_0 : i32, i32
  }
  func.func @transform_13(%arg0: i32) -> (i32, i32, i32) {
    %c0_i32 = arith.constant 0 : i32
    %c0_i32_0 = arith.constant 0 : i32
    %c0_i32_1 = arith.constant 0 : i32
    return %arg0, %c0_i32, %c0_i32_0 : i32, i32, i32
  }
}

</mosaic_0001>

<bundles_post_ra>
// kernel: model_forward.1
= control target key start
LH: loop header
LB: loop body
LE: loop exit
PB: predicated region body
PF: predicated region fallthrough
CT: control target
= control target key end

     0   :  { %18 = vsyncpa [#allocation3], 0  ;;  %s5487_s0 = inlined_call_operand.vmem [shape: f32[2,16,128], index: 0, kind: input, shape index: {}]   ;;  %s5488_s1 = inlined_call_operand.hbm [shape: bf16[3,128,128], index: 1, kind: input, shape index: {}]   ;;  %s5489_s2 = inlined_call_operand.hbm [shape: bf16[3,128,128], index: 2, kind: input, shape index: {}]   ;;  %s5490_s3 = inlined_call_operand.hbm [shape: bf16[3,128,256], index: 3, kind: input, shape index: {}]   ;;  %s5491_s4 = inlined_call_operand.hbm [shape: bf16[3,256,256], index: 4, kind: input, shape index: {}]   ;;  %s5492_s5 = inlined_call_operand.hbm [shape: bf16[3,256,256], index: 5, kind: input, shape index: {}]   ;;  %s5493_s6 = inlined_call_operand.vmem [shape: f32[2,128], index: 6, kind: input, shape index: {}]   ;;  %s5494_s7 = inlined_call_operand.vmem [shape: f32[2,128], index: 7, kind: input, shape index: {}]   ;;  %s5495_s8 = inlined_call_operand.vmem [shape: f32[2,256], index: 8, kind: input, shape index: {}]   ;;  %s5496_s9 = inlined_call_operand.vmem [shape: f32[2,256], index: 9, kind: input, shape index: {}]   ;;  %s5497_s10 = inlined_call_operand.vmem [shape: f32[2,256], index: 10, kind: input, shape index: {}]   ;;  %s5498_s11 = inlined_call_operand.hbm [shape: bf16[256,128], index: 11, kind: input, shape index: {}]   ;;  %s5499_s12 = inlined_call_operand.vmem [shape: f32[1,128], index: 12, kind: input, shape index: {}]   ;;  %s5500_s13 = inlined_call_operand.hbm [shape: f32[1,2,128], index: 13, kind: output, shape index: {}]  }
   0x1   :  { %19 = vsyncpa [#allocation6], 0 }
   0x2   :  { %20 = vsyncpa [#allocation9], 0 }
   0x3   :  { %21 = vsyncpa [#allocation12], 0 }
   0x4   :  { %22 = vsyncpa [#allocation4], 0  ;;  %s4788_s25 = smov [#allocation5]   ;;  %s4624_s29 = scalar_lea.hbm %s5489_s2, 3072 }
   0x5   :  { %s42_s26 = sshll.u32 %s4788_s25, 4  ;;  %p4625_p0 = scmp.ne.s32.totalorder %s5489_s2, %s4624_s29  ;;  %s43_s26 = int_to_ptr.vmem [resolvable:$true] %s42_s26 }
   0x6   :  { %p4628_p1 = scmp.lt.u32.totalorder %s4624_s29, %s5489_s2 }
   0x8   :  { %p4630_p2 = pnand %p4628_p1, %p4625_p0 }
   0xa   :  { %4633 = shalt.err (!%p4630_p2)
}
   0xb   :  { %s4634_s17 = scalar_lea.vmem %s43_s26, 3072  ;;  %p4639_p4 = scmp.lt.s32.totalorder %s43_s26, %s43_s26 }
   0xc   :  { %p4635_p3 = scmp.ne.s32.totalorder %s43_s26, %s4634_s17  ;;  %p4640_p5 = scmp.lt.s32.totalorder %s4634_s17, %s4634_s17 }
   0xe   :  { %p4641_p6 = por %p4640_p5, %p4639_p4 }
  0x10   :  { %p4642_p7 = pnand %p4641_p6, %p4635_p3 }
  0x12   :  { %4645 = shalt.err (!%p4642_p7)
}
  0x13   :  { %s4789_s18 = smov 64   ;;  %s4790_s19 = smov 4  }
  0x14   :  { %48 = dma.hbm_to_vmem [thread:$0]  %s5489_s2, 3072, %s43_s26, [#allocation6], %s4789_s18, %s4789_s18, %s4790_s19  }
  0x15   :  { %s4791_s22 = smov [#allocation8]   ;;  %s4792_s24 = smov [#allocation2]  }
  0x16   :  { %s66_s23 = sshll.u32 %s4791_s22, 4  ;;  %s30_s25 = sshll.u32 %s4792_s24, 4  ;;  %s67_s23 = int_to_ptr.vmem [resolvable:$true] %s66_s23  ;;  %s31_s25 = int_to_ptr.vmem [resolvable:$true] %s30_s25 }
  0x17   :  { %s4646_s29 = scalar_lea.hbm %s5491_s4, 12288 }
  0x18   :  { %p4647_p8 = scmp.ne.s32.totalorder %s5491_s4, %s4646_s29  ;;  %p4650_p9 = scmp.lt.u32.totalorder %s4646_s29, %s5491_s4 }
  0x1a   :  { %p4652_p10 = pnand %p4650_p9, %p4647_p8 }
  0x1c   :  { %4655 = shalt.err (!%p4652_p10)
}
  0x1d   :  { %s4656_s2 = scalar_lea.vmem %s67_s23, 12288  ;;  %p4661_p12 = scmp.lt.s32.totalorder %s67_s23, %s67_s23 }
  0x1e   :  { %p4657_p11 = scmp.ne.s32.totalorder %s67_s23, %s4656_s2  ;;  %p4662_p13 = scmp.lt.s32.totalorder %s4656_s2, %s4656_s2 }
  0x20   :  { %p4663_p0 = por %p4662_p13, %p4661_p12 }
  0x22   :  { %p4664_p1 = pnand %p4663_p0, %p4657_p11 }
  0x24   :  { %4667 = shalt.err (!%p4664_p1)
}
  0x25   :  { %s4793_s26 = smov 128   ;;  %s4794_s17 = smov 8  }
  0x26   :  { %72 = dma.hbm_to_vmem [thread:$0]  %s5491_s4, 12288, %s67_s23, [#allocation9], %s4793_s26, %s4793_s26, %s4794_s17  }
  0x27   :  { %s4668_s27 = scalar_lea.hbm %s5488_s1, 3072 }
  0x28   :  { %p4669_p2 = scmp.ne.s32.totalorder %s5488_s1, %s4668_s27  ;;  %p4672_p3 = scmp.lt.u32.totalorder %s4668_s27, %s5488_s1 }
  0x2a   :  { %p4674_p4 = pnand %p4672_p3, %p4669_p2 }
  0x2c   :  { %4677 = shalt.err (!%p4674_p4)
}
  0x2d   :  { %s4678_s15 = scalar_lea.vmem %s31_s25, 3072  ;;  %p4683_p6 = scmp.lt.s32.totalorder %s31_s25, %s31_s25 }
  0x2e   :  { %p4679_p5 = scmp.ne.s32.totalorder %s31_s25, %s4678_s15  ;;  %p4684_p7 = scmp.lt.s32.totalorder %s4678_s15, %s4678_s15 }
  0x30   :  { %p4685_p8 = por %p4684_p7, %p4683_p6 }
  0x32   :  { %p4686_p9 = pnand %p4685_p8, %p4679_p5 }
  0x34   :  { %4689 = shalt.err (!%p4686_p9)
}
  0x35   :  { %36 = dma.hbm_to_vmem [thread:$0]  %s5488_s1, 3072, %s31_s25, [#allocation3], %s4789_s18, %s4789_s18, %s4790_s19  }
  0x36   :  { %s4795_s16 = smov [#allocation7]   ;;  %s4796_s20 = smov [#allocation10]  }
  0x37   :  { %s54_s2 = sshll.u32 %s4795_s16, 4  ;;  %s78_s21 = sshll.u32 %s4796_s20, 4  ;;  %s55_s2 = int_to_ptr.vmem [resolvable:$true] %s54_s2  ;;  %s79_s21 = int_to_ptr.vmem [resolvable:$true] %s78_s21 }
  0x38   :  { %s4690_s27 = scalar_lea.hbm %s5490_s3, 6144 }
  0x39   :  { %p4691_p10 = scmp.ne.s32.totalorder %s5490_s3, %s4690_s27  ;;  %p4694_p11 = scmp.lt.u32.totalorder %s4690_s27, %s5490_s3 }
  0x3b   :  { %p4696_p12 = pnand %p4694_p11, %p4691_p10 }
  0x3d   :  { %4699 = shalt.err (!%p4696_p12)
}
  0x3e   :  { %s4700_s1 = scalar_lea.vmem %s55_s2, 6144  ;;  %p4705_p0 = scmp.lt.s32.totalorder %s55_s2, %s55_s2 }
  0x3f   :  { %p4701_p13 = scmp.ne.s32.totalorder %s55_s2, %s4700_s1  ;;  %p4706_p1 = scmp.lt.s32.totalorder %s4700_s1, %s4700_s1 }
  0x41   :  { %p4707_p2 = por %p4706_p1, %p4705_p0 }
  0x43   :  { %p4708_p3 = pnand %p4707_p2, %p4701_p13 }
  0x45   :  { %4711 = shalt.err (!%p4708_p3)
}
  0x46   :  { %60 = dma.hbm_to_vmem [thread:$0]  %s5490_s3, 6144, %s55_s2, [#allocation6], %s4793_s26, %s4793_s26, %s4794_s17  }
  0x47   :  { %s4712_s16 = scalar_lea.hbm %s5492_s5, 12288 }
  0x48   :  { %p4713_p4 = scmp.ne.s32.totalorder %s5492_s5, %s4712_s16  ;;  %p4716_p5 = scmp.lt.u32.totalorder %s4712_s16, %s5492_s5 }
  0x4a   :  { %p4718_p6 = pnand %p4716_p5, %p4713_p4 }
  0x4c   :  { %4721 = shalt.err (!%p4718_p6)
}
  0x4d   :  { %s4722_s28 = scalar_lea.vmem %s79_s21, 12288  ;;  %p4727_p8 = scmp.lt.s32.totalorder %s79_s21, %s79_s21 }
  0x4e   :  { %p4723_p7 = scmp.ne.s32.totalorder %s79_s21, %s4722_s28  ;;  %p4728_p9 = scmp.lt.s32.totalorder %s4722_s28, %s4722_s28 }
  0x50   :  { %p4729_p10 = por %p4728_p9, %p4727_p8 }
  0x52   :  { %p4730_p11 = pnand %p4729_p10, %p4723_p7 }
  0x54   :  { %4733 = shalt.err (!%p4730_p11)
}
  0x55   :  { %84 = dma.hbm_to_vmem [thread:$0]  %s5492_s5, 12288, %s79_s21, [#allocation9], %s4793_s26, %s4793_s26, %s4794_s17  }
  0x56   :  { %s4797_s29 = smov [#allocation11]   ;;  %s4734_s25 = scalar_lea.hbm %s5498_s11, 2048 }
  0x57   :  { %s100_s30 = sshll.u32 %s4797_s29, 4  ;;  %p4735_p12 = scmp.ne.s32.totalorder %s5498_s11, %s4734_s25  ;;  %s101_s30 = int_to_ptr.vmem [resolvable:$true] %s100_s30 }
  0x58   :  { %p4738_p13 = scmp.lt.u32.totalorder %s4734_s25, %s5498_s11 }
  0x5a   :  { %p4740_p0 = pnand %p4738_p13, %p4735_p12 }
  0x5c   :  { %4743 = shalt.err (!%p4740_p0)
}
  0x5d   :  { %s4744_s20 = scalar_lea.vmem %s101_s30, 2048  ;;  %p4749_p2 = scmp.lt.s32.totalorder %s101_s30, %s101_s30 }
  0x5e   :  { %p4745_p1 = scmp.ne.s32.totalorder %s101_s30, %s4744_s20  ;;  %p4750_p3 = scmp.lt.s32.totalorder %s4744_s20, %s4744_s20 }
  0x60   :  { %p4751_p4 = por %p4750_p3, %p4749_p2 }
  0x62   :  { %p4752_p5 = pnand %p4751_p4, %p4745_p1 }
  0x64   :  { %4755 = shalt.err (!%p4752_p5)
}
  0x65   :  { %106 = dma.hbm_to_vmem [thread:$0]  %s5498_s11, 2048, %s101_s30, [#allocation12], %s4789_s18, %s4789_s18, %s4790_s19  }
  0x66   :  { %4778 = dma.done.wait [#allocation3], 3072  }
  0x67   :  { %4779 = vsyncadd [#allocation3], 4294964224 }
  0x68   :  { %4780 = dma.done.wait [#allocation6], 9216  }
  0x69   :  { %4781 = vsyncadd [#allocation6], 4294958080 }
  0x6a   :  { %4782 = dma.done.wait [#allocation9], 24576  }
  0x6b   :  { %4783 = vsyncadd [#allocation9], 4294942720 }
  0x6c   :  { %4784 = dma.done.wait [#allocation12], 2048  }
  0x6d   :  { %4785 = vsyncadd [#allocation12], 4294965248  ;;  %v4200_v0 = vld [vmem:[#allocation2 + $0x40] sm:$0xff]   ;;  %v4201_v1 = vld [vmem:[#allocation2 + $0x48] sm:$0xff]   ;;  %v128_v2 = vlaneseq  ;;  %vm4798_vm2 = vmmov 1   ;;  %vm3370_vm11 = vcmask 1041409  }
  0x6e   :  { %4023 = vmatprep.subr.bf16.mxu0 %v4200_v0  ;;  %v4202_v3 = vld [vmem:[#allocation2 + $0x50] sm:$0xff]   ;;  %v4203_v5 = vld [vmem:[#allocation2 + $0x58] sm:$0xff]   ;;  %v4208_v6 = vld [vmem:[#allocation2] sm:$0xff]   ;;  %s4800_s1 = smov [#allocation13]  }
  0x6f   :  { %4024 = vmatpush3.bf16.msra.mxu0 %v4200_v0  ;;  %v4961_v4 = vshrl.u32 %v128_v2, 7  ;;  %v4966_v7 = vld [vmem:[%s5487_s0] sm:$0xff]  ;;  %v4971_v8 = vld [vmem:[%s5487_s0 + $0x8] sm:$0xff]  ;;  %4003 = vmatprep.subr.bf16.mxu1 %v4208_v6  ;;  %v4982_v15 = vld [vmem:[%s5487_s0 + $0x18] sm:$0xff]  ;;  %s3520_s25 = sshll.u32 %s4800_s1, 4  ;;  %s3521_s25 = int_to_ptr.vmem [resolvable:$true] %s3520_s25 }
  0x70   :  { %4025 = vmatprep.subr.bf16.mxu0 %v4201_v1  ;;  %4004 = vmatpush3.bf16.msra.mxu1 %v4208_v6  ;;  %v193_v10 = vrot.slane %v4966_v7, 7  ;;  %v194_v11 = vrot.slane %v4971_v8, 7  ;;  %v235_v12 = vpack.c.bf16 %v4971_v8, %v4966_v7  ;;  %v4204_v13 = vld [vmem:[#allocation2 + $0x60] sm:$0xff]   ;;  %v4210_v14 = vld [vmem:[#allocation2 + $0x8] sm:$0xff]   ;;  %v4212_v16 = vld [vmem:[#allocation2 + $0x10] sm:$0xff]   ;;  %v196_v17 = vrot.slane %v4982_v15, 7  ;;  %p4761_p7 = scmp.lt.s32.totalorder %s3521_s25, %s3521_s25 }
  0x71   :  { %v137_v9 = vand.u32 15, %v4961_v4  ;;  %vm197_vm0 = vcmp.lt.s32.totalorder %v4961_v4, 1  ;;  %4005 = vmatprep.subr.bf16.mxu1 %v4210_v14  ;;  %v4205_v19 = vld [vmem:[#allocation2 + $0x68] sm:$0xff]   ;;  %v4214_v20 = vld [vmem:[#allocation2 + $0x18] sm:$0xff]   ;;  %v130_v24 = vadd.s32 8, %v4961_v4  ;;  %v4206_v25 = vld [vmem:[#allocation2 + $0x70] sm:$0xff]  }
  0x72   :  { %4039 = vmatprep.mubr.bf16.mxu0 %v235_v12  ;;  %v200_v18 = vsel %vm197_vm0, %v193_v10, %v194_v11  ;;  %v201_v21 = vsel %vm197_vm0, %v196_v17, %v193_v10  ;;  %v4216_v26 = vld [vmem:[#allocation2 + $0x20] sm:$0xff]   ;;  %v131_v27 = vadd.s32 16, %v4961_v4  ;;  %v4207_v29 = vld [vmem:[#allocation2 + $0x78] sm:$0xff]   ;;  %v4218_v30 = vld [vmem:[#allocation2 + $0x28] sm:$0xff]   ;;  %v214_v33 = vrot.slane %v4966_v7, 1  ;;  %s4756_s15 = scalar_lea.vmem %s3521_s25, 32 }
  0x73   :  { %4026 = vmatpush3.bf16.msra.mxu0 %v4201_v1  ;;  %vm181_vm1 = vcmp.ge.s32.totalorder %v137_v9, 1  ;;  %v3541_v23 = vpack.c.bf16 %v200_v18, %v201_v21  ;;  %v144_v28 = vand.u32 15, %v130_v24  ;;  %v5003_v32 = vld [vmem:[%s5487_s0 + $0x10] sm:$0xff]  ;;  %v215_v34 = vrot.slane %v4971_v8, 1  ;;  %v4209_v36 = vld [vmem:[#allocation2 + $0x80] sm:$0xff]   ;;  %v4211_v41 = vld [vmem:[#allocation2 + $0x88] sm:$0xff]   ;;  %p4757_p6 = scmp.ne.s32.totalorder %s3521_s25, %s4756_s15  ;;  %p4762_p8 = scmp.lt.s32.totalorder %s4756_s15, %s4756_s15 }
  0x74   :  { %4027 = vmatprep.subr.bf16.mxu0 %v4202_v3  ;;  %4006 = vmatpush3.bf16.msra.mxu1 %v4210_v14  ;;  %vm4992_vm3 = vmpackc.low %vm4798_vm2, %vm181_vm1  ;;  %v151_v31 = vand.u32 15, %v131_v27  ;;  %v216_v35 = vrot.slane %v5003_v32, 1  ;;  %vm218_vm5 = vcmp.lt.s32.totalorder %v4961_v4, 7  ;;  %v4220_v37 = vld [vmem:[#allocation2 + $0x30] sm:$0xff]   ;;  %v195_v38 = vrot.slane %v5003_v32, 7  ;;  %v4222_v42 = vld [vmem:[#allocation2 + $0x38] sm:$0xff]  }
  0x75   :  { %4007 = vmatprep.subr.bf16.mxu1 %v4212_v16  ;;  %4019 = vmatprep.mubr.msk.bf16.mxu1 %vm4992_vm3, %v3541_v23  ;;  %vm186_vm4 = vcmp.lt.s32.totalorder %v144_v28, 15  ;;  %v236_v40 = vpack.c.bf16 %v4982_v15, %v5003_v32  ;;  %v221_v44 = vsel %vm218_vm5, %v214_v33, %v215_v34  ;;  %v4213_v47 = vld [vmem:[#allocation2 + $0x90] sm:$0xff]   ;;  %v4224_v48 = vld [vmem:[#allocation5] sm:$0xff]   ;;  %v4215_v51 = vld [vmem:[#allocation2 + $0x98] sm:$0xff]   ;;  %v132_v56 = vadd.s32 24, %v4961_v4  ;;  %p4763_p9 = por %p4762_p8, %p4761_p7 }
  0x76   :  { %vm183_vm6 = vcmp.ge.s32.totalorder %v151_v31, 1  ;;  %vm5011_vm7 = vmpackc.low %vm186_vm4, %vm4798_vm2  ;;  %v220_v43 = vsel %vm218_vm5, %v215_v34, %v216_v35  ;;  %v198_v49 = vsel %vm197_vm0, %v195_v38, %v196_v17  ;;  %v199_v50 = vsel %vm197_vm0, %v194_v11, %v195_v38  ;;  %v4225_v53 = vld [vmem:[#allocation5 + $0x8] sm:$0xff]   ;;  %v4217_v54 = vld [vmem:[#allocation2 + $0xa0] sm:$0xff]  }
  0x77   :  { %4028 = vmatpush3.bf16.msra.mxu0 %v4202_v3  ;;  %vm5026_vm8 = vmpackc.low %vm4798_vm2, %vm183_vm6  ;;  %v3563_v46 = vpack.c.bf16 %v220_v43, %v221_v44  ;;  %v3544_v52 = vpack.c.bf16 %v198_v49, %v199_v50  ;;  %v4226_v55 = vld [vmem:[#allocation5 + $0x10] sm:$0xff]   ;;  %v4219_v57 = vld [vmem:[#allocation2 + $0xa8] sm:$0xff]   ;;  %v158_v58 = vand.u32 15, %v132_v56  ;;  %v217_v61 = vrot.slane %v4982_v15, 1  ;;  %p4764_p10 = pnand %p4763_p9, %p4757_p6 }
  0x78   :  { %4029 = vmatprep.subr.bf16.mxu0 %v4203_v5  ;;  %4008 = vmatpush3.bf16.msra.mxu1 %v4212_v16  ;;  %v4221_v59 = vld [vmem:[#allocation2 + $0xb0] sm:$0xff]   ;;  %v4223_v60 = vld [vmem:[#allocation2 + $0xb8] sm:$0xff]   ;;  %v4228_v3 = vld [vmem:[#allocation5 + $0x20] sm:$0xff]   ;;  %v5061_v24 = vsub.s32 0, %v4961_v4 }
  0x79   :  { %4009 = vmatprep.subr.bf16.mxu1 %v4214_v20  ;;  %vm188_vm9 = vcmp.lt.s32.totalorder %v158_v58, 15  ;;  %v219_v63 = vsel %vm218_vm5, %v216_v35, %v217_v61  ;;  %v222_v0 = vsel %vm218_vm5, %v217_v61, %v214_v33  ;;  %v4227_v2 = vld [vmem:[#allocation5 + $0x18] sm:$0xff]   ;;  %v4230_v6 = vld [vmem:[#allocation5 + $0x30] sm:$0xff]   ;;  %v5057_v8 = vld [vmem:[#allocation5 + $0x40] sm:$0xff]  }
  0x7a   :  { %vm5043_vm10 = vmpackc.low %vm188_vm9, %vm4798_vm2  ;;  %v3566_v1 = vpack.c.bf16 %v222_v0, %v219_v63  ;;  %v4231_v7 = vld [vmem:[#allocation5 + $0x38] sm:$0xff]   ;;  %v4248_v9 = vld [vmem:[#allocation7] ss:$8 sps:$4 sm:$0xff]  }
  0x7b   :  { %4030 = vmatpush3.bf16.msra.mxu0 %v4203_v5  ;;  %v4229_v5 = vld [vmem:[#allocation5 + $0x28] sm:$0xff]   ;;  %v4253_v11 = vld [vmem:[#allocation7 + $0x14] ss:$8 sps:$4 sm:$0xff]   ;;  %v4251_v12 = vld [vmem:[#allocation7 + $0x10] ss:$8 sps:$4 sm:$0xff]  }
  0x7c   :  { %4031 = vmatprep.subr.bf16.mxu0 %v4204_v13  ;;  %4010 = vmatpush3.bf16.msra.mxu1 %v4214_v20  ;;  %v4250_v10 = vld [vmem:[#allocation7 + $0x4] ss:$8 sps:$4 sm:$0xff]   ;;  %v4254_v14 = vld [vmem:[#allocation7 + $0x20] ss:$8 sps:$4 sm:$0xff]   ;;  %v4259_v15 = vld [vmem:[#allocation7 + $0x34] ss:$8 sps:$4 sm:$0xff]  }
  0x7d   :  { %4011 = vmatprep.subr.bf16.mxu1 %v4216_v26  ;;  %v4257_v16 = vld [vmem:[#allocation7 + $0x30] ss:$8 sps:$4 sm:$0xff]   ;;  %v4262_v17 = vld [vmem:[#allocation7 + $0x44] ss:$8 sps:$4 sm:$0xff]   ;;  %v4260_v18 = vld [vmem:[#allocation7 + $0x40] ss:$8 sps:$4 sm:$0xff]  }
  0x7e   :  { %v4526_v22 = vld [vmem:[#allocation10 + $0x144] ss:$8 sps:$4 sm:$0xff]   ;;  %v4533_v45 = vld [vmem:[#allocation10 + $0x170] ss:$8 sps:$4 sm:$0xff]  }
  0x7f   :  { %4032 = vmatpush3.bf16.msra.mxu0 %v4204_v13  ;;  %v4256_v13 = vld [vmem:[#allocation7 + $0x24] ss:$8 sps:$4 sm:$0xff]   ;;  %v4612_v39 = vld [vmem:[#allocation11 + $0x50] sm:$0xff]  }
  0x80   :  { %4033 = vmatprep.subr.bf16.mxu0 %v4205_v19  ;;  %4012 = vmatpush3.bf16.msra.mxu1 %v4216_v26  ;;  %v5067_v26 = vsub.s32 1, %v4961_v4  ;;  %v4618_v62 = vld [vmem:[#allocation11 + $0x68] sm:$0xff]  }
  0x81   :  { %4013 = vmatprep.subr.bf16.mxu1 %v4218_v30 }
  0x83   :  { %4034 = vmatpush3.bf16.msra.mxu0 %v4205_v19 }
  0x84   :  { %4035 = vmatprep.subr.bf16.mxu0 %v4206_v25  ;;  %4014 = vmatpush3.bf16.msra.mxu1 %v4218_v30 }
  0x85   :  { %4015 = vmatprep.subr.bf16.mxu1 %v4220_v37 }
  0x87   :  { %4036 = vmatpush3.bf16.msra.mxu0 %v4206_v25  ;;  %v586_v25 = vld [vmem:[%s5493_s6] sm:$0x3] }
  0x88   :  { %4037 = vmatprep.subr.bf16.mxu0 %v4207_v29  ;;  %4016 = vmatpush3.bf16.msra.mxu1 %v4220_v37  ;;  %v590_v27 = vrot.slane %v586_v25, %v5061_v24  ;;  %v598_v30 = vrot.slane %v586_v25, %v5067_v26  ;;  %v4245_v25 = vld [vmem:[#allocation5 + $0xa8] sm:$0xff]  }
  0x89   :  { %4017 = vmatprep.subr.bf16.mxu1 %v4222_v42 }
  0x8b   :  { %4038 = vmatpush3.bf16.msra.mxu0 %v4207_v29 }
  0x8c   :  { %4043 = vmatprep.subr.bf16.mxu0 %v4209_v36  ;;  %4018 = vmatpush3.bf16.msra.mxu1 %v4222_v42 }
  0x8d   :  { %4063 = vmatprep.subr.bf16.mxu1 %v4224_v48 }
  0x8e   :  { %4040 = vmatmul.mubr.bf16.vlgmr.msra.gmra.mrb[0].mxu0 %v236_v40 }
  0x8f   :  { %4044 = vmatpush3.bf16.msra.mxu0 %v4209_v36  ;;  %4059 = vmatprep.mubr.msk.bf16.mxu0 %vm5011_vm7, %v3563_v46 }
  0x90   :  { %4045 = vmatprep.subr.bf16.mxu0 %v4211_v41  ;;  %4020 = vmatmul.mubr.msk.bf16.vlgmr.msra.gmra.mrb[0].mxu1 %vm5026_vm8, %v3544_v52 }
  0x91   :  { %4064 = vmatpush3.bf16.msra.mxu1 %v4224_v48 }
  0x92   :  { %4065 = vmatprep.subr.bf16.mxu1 %v4225_v53 }
  0x93   :  { %4046 = vmatpush3.bf16.msra.mxu0 %v4211_v41 }
  0x94   :  { %4047 = vmatprep.subr.bf16.mxu0 %v4213_v47 }
  0x95   :  { %4066 = vmatpush3.bf16.msra.mxu1 %v4225_v53 }
  0x96   :  { %4067 = vmatprep.subr.bf16.mxu1 %v4226_v55 }
  0x97   :  { %4048 = vmatpush3.bf16.msra.mxu0 %v4213_v47 }
  0x98   :  { %4049 = vmatprep.subr.bf16.mxu0 %v4215_v51 }
  0x99   :  { %4068 = vmatpush3.bf16.msra.mxu1 %v4226_v55 }
  0x9a   :  { %4069 = vmatprep.subr.bf16.mxu1 %v4227_v2 }
  0x9b   :  { %4050 = vmatpush3.bf16.msra.mxu0 %v4215_v51 }
  0x9c   :  { %4051 = vmatprep.subr.bf16.mxu0 %v4217_v54 }
  0x9d   :  { %4070 = vmatpush3.bf16.msra.mxu1 %v4227_v2 }
  0x9e   :  { %4071 = vmatprep.subr.bf16.mxu1 %v4228_v3 }
  0x9f   :  { %4052 = vmatpush3.bf16.msra.mxu0 %v4217_v54 }
  0xa0   :  { %4053 = vmatprep.subr.bf16.mxu0 %v4219_v57 }
  0xa1   :  { %4072 = vmatpush3.bf16.msra.mxu1 %v4228_v3 }
  0xa2   :  { %4073 = vmatprep.subr.bf16.mxu1 %v4229_v5 }
  0xa3   :  { %4054 = vmatpush3.bf16.msra.mxu0 %v4219_v57 }
  0xa4   :  { %4055 = vmatprep.subr.bf16.mxu0 %v4221_v59 }
  0xa5   :  { %4074 = vmatpush3.bf16.msra.mxu1 %v4229_v5 }
  0xa6   :  { %4075 = vmatprep.subr.bf16.mxu1 %v4230_v6 }
  0xa7   :  { %4056 = vmatpush3.bf16.msra.mxu0 %v4221_v59 }
  0xa8   :  { %4057 = vmatprep.subr.bf16.mxu0 %v4223_v60 }
  0xa9   :  { %4076 = vmatpush3.bf16.msra.mxu1 %v4230_v6 }
  0xaa   :  { %4077 = vmatprep.subr.bf16.mxu1 %v4231_v7 }
  0xab   :  { %4058 = vmatpush3.bf16.msra.mxu0 %v4223_v60 }
  0xac   :  { %1144 = vmatprep.subr.bf16.mxu0 %v4250_v10 }
  0xad   :  { %4078 = vmatpush3.bf16.msra.mxu1 %v4231_v7 }
  0xae   :  { %4060 = vmatmul.mubr.msk.bf16.vlgmr.msra.gmra.mrb[0].mxu0 %vm5043_vm10, %v3566_v1  ;;  %4083 = vmatprep.subr.bf16.mxu1 %v5057_v8 }
  0xaf   :  { %1145 = vmatpush1.bf16.msra.mxu0 %v4248_v9 }
  0xb0   :  { %1146 = vmatprep.subr.bf16.mxu0 %v4253_v11 }
  0xb3   :  { %1147 = vmatpush1.bf16.msra.mxu0 %v4251_v12  ;;  %v4233_v12 = vld [vmem:[#allocation5 + $0x48] sm:$0xff]  }
  0xb4   :  { %1148 = vmatprep.subr.bf16.mxu0 %v4256_v13  ;;  %v4234_v13 = vld [vmem:[#allocation5 + $0x50] sm:$0xff]  }
  0xb7   :  { %1149 = vmatpush1.bf16.msra.mxu0 %v4254_v14  ;;  %v4235_v14 = vld [vmem:[#allocation5 + $0x58] sm:$0xff]  }
  0xb8   :  { %1150 = vmatprep.subr.bf16.mxu0 %v4259_v15  ;;  %v4236_v15 = vld [vmem:[#allocation5 + $0x60] sm:$0xff]  }
  0xbb   :  { %1151 = vmatpush1.bf16.msra.mxu0 %v4257_v16  ;;  %v4237_v16 = vld [vmem:[#allocation5 + $0x68] sm:$0xff]  }
  0xbc   :  { %1152 = vmatprep.subr.bf16.mxu0 %v4262_v17  ;;  %v4238_v17 = vld [vmem:[#allocation5 + $0x70] sm:$0xff]  }
  0xbf   :  { %1153 = vmatpush1.bf16.msra.mxu0 %v4260_v18  ;;  %v4239_v18 = vld [vmem:[#allocation5 + $0x78] sm:$0xff]  }
 0x163   :  { %v4021_v19 = vpop.f32.mrb[0].mxu1 }
 0x164   :  { %v354_v20 = vpop.f32.mrb[1].mxu1 }
 0x165   :  { %v4022_v21 = vpop.f32.mrb[2].mxu1 }
 0x166   :  { %v357_v23 = vpop.f32.mrb[3].mxu1 }
 0x181   :  { %v4061_v28 = vpop.f32.mrb[0].mxu0 }
 0x182   :  { %v4123_v29 = vadd.f32 %v4061_v28, %v4021_v19  ;;  %v567_v31 = vpop.f32.mrb[1].mxu0  ;;  %v4241_v19 = vld [vmem:[#allocation5 + $0x88] sm:$0xff]   ;;  %v4247_v28 = vld [vmem:[#allocation5 + $0xb8] sm:$0xff]  }
 0x183   :  { %v4124_v32 = vadd.f32 %v567_v31, %v354_v20  ;;  %v4062_v33 = vpop.f32.mrb[2].mxu0  ;;  %v4242_v20 = vld [vmem:[#allocation5 + $0x90] sm:$0xff]   ;;  %v4268_v31 = vld [vmem:[#allocation7 + $0x64] ss:$8 sps:$4 sm:$0xff]  }
 0x184   :  { %v593_v34 = vmul.f32 %v4123_v29, %v590_v27  ;;  %v4125_v35 = vadd.f32 %v4062_v33, %v4022_v21  ;;  %v570_v36 = vpop.f32.mrb[3].mxu0  ;;  %v4243_v21 = vld [vmem:[#allocation5 + $0x98] sm:$0xff]  }
 0x185   :  { %v591_v37 = vmul.f32 %v4124_v32, %v590_v27  ;;  %v4126_v38 = vadd.f32 %v570_v36, %v357_v23  ;;  %v4244_v23 = vld [vmem:[#allocation5 + $0xa0] sm:$0xff]   ;;  %v4265_v29 = vld [vmem:[#allocation7 + $0x54] ss:$8 sps:$4 sm:$0xff]   ;;  %v4799_v36 = vmov 0  }
 0x186   :  { %v601_v40 = vadd.f32 %v598_v30, %v593_v34  ;;  %v594_v41 = vmul.f32 %v4125_v35, %v590_v27  ;;  %1154 = vmatprep.subr.bf16.mxu0 %v4265_v29  ;;  %v4266_v32 = vld [vmem:[#allocation7 + $0x60] ss:$8 sps:$4 sm:$0xff]   ;;  %v4271_v33 = vld [vmem:[#allocation7 + $0x74] ss:$8 sps:$4 sm:$0xff]   ;;  %v4269_v34 = vld [vmem:[#allocation7 + $0x70] ss:$8 sps:$4 sm:$0xff]   ;;  %1176 = vmatprep.mubr.bf16.mxu0 %v4799_v36 }
 0x187   :  { %v599_v42 = vadd.f32 %v598_v30, %v591_v37  ;;  %v592_v43 = vmul.f32 %v4126_v38, %v590_v27  ;;  %v4246_v27 = vld [vmem:[#allocation5 + $0xb0] sm:$0xff]   ;;  %v4274_v35 = vld [vmem:[#allocation7 + $0x84] ss:$8 sps:$4 sm:$0xff]   ;;  %v4320_v37 = vld [vmem:[#allocation8] ss:$8 sps:$4 sm:$0xff]  }
 0x188   :  { %v605_v44 = vmax.f32 %v601_v40, 0.0  ;;  %v602_v46 = vadd.f32 %v598_v30, %v594_v41  ;;  %v4322_v38 = vld [vmem:[#allocation8 + $0x4] ss:$8 sps:$4 sm:$0xff]   ;;  %v4325_v40 = vld [vmem:[#allocation8 + $0x14] ss:$8 sps:$4 sm:$0xff]  }
 0x189   :  { %v603_v47 = vmax.f32 %v599_v42, 0.0  ;;  %v600_v48 = vadd.f32 %v598_v30, %v592_v43  ;;  %v4263_v30 = vld [vmem:[#allocation7 + $0x50] ss:$8 sps:$4 sm:$0xff]   ;;  %v4328_v42 = vld [vmem:[#allocation8 + $0x24] ss:$8 sps:$4 sm:$0xff]  }
 0x18a   :  { %v606_v49 = vmax.f32 %v602_v46, 0.0  ;;  %v609_v50 = vrot.slane %v605_v44, 7  ;;  %v621_v54 = vrot.slane %v605_v44, 1  ;;  %1155 = vmatpush1.bf16.msra.mxu0 %v4263_v30  ;;  %v4323_v41 = vld [vmem:[#allocation8 + $0x10] ss:$8 sps:$4 sm:$0xff]  }
 0x18b   :  { %v607_v51 = vrot.slane %v603_v47, 7  ;;  %v619_v52 = vrot.slane %v603_v47, 1  ;;  %v604_v53 = vmax.f32 %v600_v48, 0.0  ;;  %1156 = vmatprep.subr.bf16.mxu0 %v4268_v31  ;;  %v4326_v43 = vld [vmem:[#allocation8 + $0x20] ss:$8 sps:$4 sm:$0xff]  }
 0x18c   :  { %v610_v55 = vrot.slane %v606_v49, 7  ;;  %v622_v56 = vrot.slane %v606_v49, 1  ;;  %v632_v57 = vpack.c.bf16 %v606_v49, %v605_v44  ;;  %v4331_v44 = vld [vmem:[#allocation8 + $0x34] ss:$8 sps:$4 sm:$0xff]   ;;  %v4329_v46 = vld [vmem:[#allocation8 + $0x30] ss:$8 sps:$4 sm:$0xff]  }
 0x18d   :  { %v608_v58 = vrot.slane %v604_v53, 7  ;;  %v620_v59 = vrot.slane %v604_v53, 1  ;;  %v631_v60 = vpack.c.bf16 %v604_v53, %v603_v47  ;;  %v4334_v47 = vld [vmem:[#allocation8 + $0x44] ss:$8 sps:$4 sm:$0xff]   ;;  %v4332_v48 = vld [vmem:[#allocation8 + $0x40] ss:$8 sps:$4 sm:$0xff]  }
 0x18e   :  { %v614_v61 = vsel %vm197_vm0, %v610_v55, %v607_v51  ;;  %v611_v63 = vsel %vm197_vm0, %v609_v50, %v610_v55  ;;  %v623_v0 = vsel %vm218_vm5, %v621_v54, %v622_v56  ;;  %v626_v1 = vsel %vm218_vm5, %v622_v56, %v619_v52  ;;  %1157 = vmatpush1.bf16.msra.mxu0 %v4266_v32  ;;  %v4337_v49 = vld [vmem:[#allocation8 + $0x54] ss:$8 sps:$4 sm:$0xff]   ;;  %v4346_v55 = vld [vmem:[#allocation8 + $0x84] ss:$8 sps:$4 sm:$0xff]   ;;  %v4344_v56 = vld [vmem:[#allocation8 + $0x80] ss:$8 sps:$4 sm:$0xff]  }
 0x18f   :  { %v613_v2 = vsel %vm197_vm0, %v607_v51, %v608_v58  ;;  %v612_v3 = vsel %vm197_vm0, %v608_v58, %v609_v50  ;;  %v624_v5 = vsel %vm218_vm5, %v620_v59, %v621_v54  ;;  %v625_v6 = vsel %vm218_vm5, %v619_v52, %v620_v59  ;;  %1158 = vmatprep.subr.bf16.mxu0 %v4271_v33  ;;  %v4335_v50 = vld [vmem:[#allocation8 + $0x50] ss:$8 sps:$4 sm:$0xff]   ;;  %v4340_v51 = vld [vmem:[#allocation8 + $0x64] ss:$8 sps:$4 sm:$0xff]   ;;  %v4338_v52 = vld [vmem:[#allocation8 + $0x60] ss:$8 sps:$4 sm:$0xff]  }
 0x190   :  { %v3577_v7 = vpack.c.bf16 %v613_v2, %v614_v61  ;;  %v3580_v9 = vpack.c.bf16 %v611_v63, %v612_v3  ;;  %v3599_v10 = vpack.c.bf16 %v624_v5, %v625_v6  ;;  %v3602_v11 = vpack.c.bf16 %v626_v1, %v623_v0  ;;  %v4343_v53 = vld [vmem:[#allocation8 + $0x74] ss:$8 sps:$4 sm:$0xff]   ;;  %v4341_v54 = vld [vmem:[#allocation8 + $0x70] ss:$8 sps:$4 sm:$0xff]   ;;  %v982_v58 = vld [vmem:[%s5494_s7] sm:$0x3] }
 0x191   :  { %v4347_v59 = vld [vmem:[#allocation8 + $0x90] ss:$8 sps:$4 sm:$0xff]   ;;  %v986_v61 = vrot.slane %v982_v58, %v5061_v24  ;;  %v4350_v63 = vld [vmem:[#allocation8 + $0xa0] ss:$8 sps:$4 sm:$0xff]   ;;  %v994_v0 = vrot.slane %v982_v58, %v5067_v26 }
 0x192   :  { %4079 = vmatprep.mubr.msk.bf16.mxu1 %vm4992_vm3, %v3577_v7  ;;  %1159 = vmatpush1.bf16.msra.mxu0 %v4269_v34  ;;  %v4290_v58 = vld [vmem:[#allocation7 + $0xe0] ss:$8 sps:$4 sm:$0xff]  }
 0x193   :  { %4080 = vmatmul.mubr.msk.bf16.vlgmr.msra.gmra.mrb[4].mxu1 %vm5026_vm8, %v3580_v9  ;;  %1277 = vmatprep.subr.bf16.mxu0 %v4274_v35 }
 0x194   :  { %4084 = vmatpush3.bf16.msra.mxu1 %v5057_v8  ;;  %4099 = vmatprep.mubr.bf16.mxu1 %v631_v60  ;;  %v4240_v8 = vld [vmem:[#allocation5 + $0x80] sm:$0xff]  }
 0x195   :  { %4085 = vmatprep.subr.bf16.mxu1 %v4233_v12  ;;  %v4352_v60 = vld [vmem:[#allocation8 + $0xa4] ss:$8 sps:$4 sm:$0xff]  }
 0x198   :  { %4086 = vmatpush3.bf16.msra.mxu1 %v4233_v12 }
 0x199   :  { %4087 = vmatprep.subr.bf16.mxu1 %v4234_v13 }
 0x19c   :  { %4088 = vmatpush3.bf16.msra.mxu1 %v4234_v13 }
 0x19d   :  { %4089 = vmatprep.subr.bf16.mxu1 %v4235_v14 }
 0x1a0   :  { %4090 = vmatpush3.bf16.msra.mxu1 %v4235_v14 }
 0x1a1   :  { %4091 = vmatprep.subr.bf16.mxu1 %v4236_v15 }
 0x1a4   :  { %4092 = vmatpush3.bf16.msra.mxu1 %v4236_v15 }
 0x1a5   :  { %4093 = vmatprep.subr.bf16.mxu1 %v4237_v16 }
 0x1a8   :  { %4094 = vmatpush3.bf16.msra.mxu1 %v4237_v16 }
 0x1a9   :  { %4095 = vmatprep.subr.bf16.mxu1 %v4238_v17 }
 0x1ac   :  { %4096 = vmatpush3.bf16.msra.mxu1 %v4238_v17 }
 0x1ad   :  { %4097 = vmatprep.subr.bf16.mxu1 %v4239_v18 }
 0x1b0   :  { %4098 = vmatpush3.bf16.msra.mxu1 %v4239_v18 }
 0x1b1   :  { %4103 = vmatprep.subr.bf16.mxu1 %v4240_v8 }
 0x1b3   :  { %4100 = vmatmul.mubr.bf16.vlgmr.msra.gmra.mrb[4].mxu1 %v632_v57  ;;  %v4349_v57 = vld [vmem:[#allocation8 + $0x94] ss:$8 sps:$4 sm:$0xff]  }
 0x1b4   :  { %4104 = vmatpush3.bf16.msra.mxu1 %v4240_v8  ;;  %4119 = vmatprep.mubr.msk.bf16.mxu1 %vm5011_vm7, %v3599_v10 }
 0x1b5   :  { %4105 = vmatprep.subr.bf16.mxu1 %v4241_v19 }
 0x1b8   :  { %4106 = vmatpush3.bf16.msra.mxu1 %v4241_v19 }
 0x1b9   :  { %4107 = vmatprep.subr.bf16.mxu1 %v4242_v20 }
 0x1bc   :  { %4108 = vmatpush3.bf16.msra.mxu1 %v4242_v20 }
 0x1bd   :  { %4109 = vmatprep.subr.bf16.mxu1 %v4243_v21 }
 0x1c0   :  { %4110 = vmatpush3.bf16.msra.mxu1 %v4243_v21 }
 0x1c1   :  { %4111 = vmatprep.subr.bf16.mxu1 %v4244_v23 }
 0x1c4   :  { %4112 = vmatpush3.bf16.msra.mxu1 %v4244_v23 }
 0x1c5   :  { %4113 = vmatprep.subr.bf16.mxu1 %v4245_v25 }
 0x1c8   :  { %4114 = vmatpush3.bf16.msra.mxu1 %v4245_v25 }
 0x1c9   :  { %4115 = vmatprep.subr.bf16.mxu1 %v4246_v27 }
 0x1cc   :  { %4116 = vmatpush3.bf16.msra.mxu1 %v4246_v27 }
 0x1cd   :  { %4117 = vmatprep.subr.bf16.mxu1 %v4247_v28 }
 0x1d0   :  { %4118 = vmatpush3.bf16.msra.mxu1 %v4247_v28 }
 0x1d1   :  { %1833 = vmatprep.subr.bf16.mxu1 %v4322_v38 }
 0x1d3   :  { %4120 = vmatmul.mubr.msk.bf16.vlgmr.msra.gmra.mrb[4].mxu1 %vm5043_vm10, %v3602_v11 }
 0x1d4   :  { %1834 = vmatpush1.bf16.msra.mxu1 %v4320_v37 }
 0x1d5   :  { %1835 = vmatprep.subr.bf16.mxu1 %v4325_v40  ;;  %v4272_v40 = vld [vmem:[#allocation7 + $0x80] ss:$8 sps:$4 sm:$0xff]  }
 0x1d8   :  { %1836 = vmatpush1.bf16.msra.mxu1 %v4323_v41 }
 0x1d9   :  { %1837 = vmatprep.subr.bf16.mxu1 %v4328_v42 }
 0x1dc   :  { %1838 = vmatpush1.bf16.msra.mxu1 %v4326_v43 }
 0x1dd   :  { %1839 = vmatprep.subr.bf16.mxu1 %v4331_v44  ;;  %v4277_v44 = vld [vmem:[#allocation7 + $0x94] ss:$8 sps:$4 sm:$0xff]  }
 0x1e0   :  { %1840 = vmatpush1.bf16.msra.mxu1 %v4329_v46 }
 0x1e1   :  { %1841 = vmatprep.subr.bf16.mxu1 %v4334_v47 }
 0x1e4   :  { %1842 = vmatpush1.bf16.msra.mxu1 %v4332_v48  ;;  %v4275_v48 = vld [vmem:[#allocation7 + $0x90] ss:$8 sps:$4 sm:$0xff]  }
 0x1e5   :  { %1843 = vmatprep.subr.bf16.mxu1 %v4337_v49  ;;  %v4280_v49 = vld [vmem:[#allocation7 + $0xa4] ss:$8 sps:$4 sm:$0xff]  }
 0x1e8   :  { %1844 = vmatpush1.bf16.msra.mxu1 %v4335_v50  ;;  %v4278_v50 = vld [vmem:[#allocation7 + $0xa0] ss:$8 sps:$4 sm:$0xff]  }
 0x1e9   :  { %1845 = vmatprep.subr.bf16.mxu1 %v4340_v51  ;;  %v4283_v51 = vld [vmem:[#allocation7 + $0xb4] ss:$8 sps:$4 sm:$0xff]  }
 0x1ec   :  { %1846 = vmatpush1.bf16.msra.mxu1 %v4338_v52  ;;  %v4281_v52 = vld [vmem:[#allocation7 + $0xb0] ss:$8 sps:$4 sm:$0xff]  }
 0x1ed   :  { %1847 = vmatprep.subr.bf16.mxu1 %v4343_v53  ;;  %v4286_v53 = vld [vmem:[#allocation7 + $0xc4] ss:$8 sps:$4 sm:$0xff]  }
 0x1f0   :  { %1848 = vmatpush1.bf16.msra.mxu1 %v4341_v54  ;;  %v4284_v54 = vld [vmem:[#allocation7 + $0xc0] ss:$8 sps:$4 sm:$0xff]  }
 0x1f1   :  { %1849 = vmatprep.subr.bf16.mxu1 %v4346_v55  ;;  %v4289_v55 = vld [vmem:[#allocation7 + $0xd4] ss:$8 sps:$4 sm:$0xff]  }
 0x1f4   :  { %1850 = vmatpush1.bf16.msra.mxu1 %v4344_v56  ;;  %v4287_v56 = vld [vmem:[#allocation7 + $0xd0] ss:$8 sps:$4 sm:$0xff]  }
 0x1f5   :  { %1851 = vmatprep.subr.bf16.mxu1 %v4349_v57  ;;  %v4292_v57 = vld [vmem:[#allocation7 + $0xe4] ss:$8 sps:$4 sm:$0xff]  }
 0x1f8   :  { %1852 = vmatpush1.bf16.msra.mxu1 %v4347_v59  ;;  %v4295_v59 = vld [vmem:[#allocation7 + $0xf4] ss:$8 sps:$4 sm:$0xff]  }
 0x1f9   :  { %1853 = vmatprep.subr.bf16.mxu1 %v4352_v60  ;;  %v4293_v60 = vld [vmem:[#allocation7 + $0xf0] ss:$8 sps:$4 sm:$0xff]  }
 0x1fc   :  { %1854 = vmatpush1.bf16.msra.mxu1 %v4350_v63  ;;  %v4296_v63 = vld [vmem:[#allocation7 + $0x100] ss:$8 sps:$4 sm:$0xff]  }
 0x2a6   :  { %v4121_v1 = vpop.f32.mrb[4].mxu1 }
 0x2a7   :  { %v989_v2 = vmul.f32 %v4121_v1, %v986_v61  ;;  %v963_v3 = vpop.f32.mrb[5].mxu1  ;;  %v4299_v1 = vld [vmem:[#allocation7 + $0x110] ss:$8 sps:$4 sm:$0xff]  }
 0x2a8   :  { %v987_v5 = vmul.f32 %v986_v61, %v963_v3  ;;  %v4122_v6 = vpop.f32.mrb[6].mxu1  ;;  %v4302_v3 = vld [vmem:[#allocation7 + $0x120] ss:$8 sps:$4 sm:$0xff]  }
 0x2a9   :  { %v997_v7 = vadd.f32 %v994_v0, %v989_v2  ;;  %v990_v9 = vmul.f32 %v4122_v6, %v986_v61  ;;  %v966_v10 = vpop.f32.mrb[7].mxu1  ;;  %v4304_v2 = vld [vmem:[#allocation7 + $0x124] ss:$8 sps:$4 sm:$0xff]   ;;  %v4305_v6 = vld [vmem:[#allocation7 + $0x130] ss:$8 sps:$4 sm:$0xff]  }
 0x2aa   :  { %v995_v11 = vadd.f32 %v994_v0, %v987_v5  ;;  %v988_v12 = vmul.f32 %v986_v61, %v966_v10  ;;  %v4298_v61 = vld [vmem:[#allocation7 + $0x104] ss:$8 sps:$4 sm:$0xff]   ;;  %v4307_v5 = vld [vmem:[#allocation7 + $0x134] ss:$8 sps:$4 sm:$0xff]  }
 0x2ab   :  { %v5102_v13 = vmax.f32 %v997_v7, 0.0  ;;  %v998_v14 = vadd.f32 %v994_v0, %v990_v9  ;;  %v4310_v7 = vld [vmem:[#allocation7 + $0x144] ss:$8 sps:$4 sm:$0xff]   ;;  %v4308_v9 = vld [vmem:[#allocation7 + $0x140] ss:$8 sps:$4 sm:$0xff]  }
 0x2ac   :  { %v5104_v15 = vmax.f32 %v995_v11, 0.0  ;;  %v996_v16 = vadd.f32 %v994_v0, %v988_v12  ;;  %v4301_v0 = vld [vmem:[#allocation7 + $0x114] ss:$8 sps:$4 sm:$0xff]   ;;  %v4311_v11 = vld [vmem:[#allocation7 + $0x150] ss:$8 sps:$4 sm:$0xff]  }
 0x2ad   :  { %v5106_v17 = vmax.f32 %v998_v14, 0.0  ;;  %v1005_v18 = vrot.slane %v5102_v13, 7  ;;  %v1017_v21 = vrot.slane %v5102_v13, 1  ;;  %v4313_v10 = vld [vmem:[#allocation7 + $0x154] ss:$8 sps:$4 sm:$0xff]  }
 0x2ae   :  { %v1003_v8 = vrot.slane %v5104_v15, 7  ;;  %v1015_v19 = vrot.slane %v5104_v15, 1  ;;  %v1000_v20 = vmax.f32 %v996_v16, 0.0  ;;  %v4316_v12 = vld [vmem:[#allocation7 + $0x164] ss:$8 sps:$4 sm:$0xff]  }
 0x2af   :  { %v1006_v23 = vrot.slane %v5106_v17, 7  ;;  %v1018_v25 = vrot.slane %v5106_v17, 1  ;;  %v1028_v27 = vpack.c.bf16 %v5106_v17, %v5102_v13  ;;  %v4314_v14 = vld [vmem:[#allocation7 + $0x160] ss:$8 sps:$4 sm:$0xff]   ;;  %v4317_v13 = vld [vmem:[#allocation7 + $0x170] ss:$8 sps:$4 sm:$0xff]  }
 0x2b0   :  { %v1004_v28 = vrot.slane %v1000_v20, 7  ;;  %v1016_v29 = vrot.slane %v1000_v20, 1  ;;  %v1027_v30 = vpack.c.bf16 %v1000_v20, %v5104_v15  ;;  %v4319_v15 = vld [vmem:[#allocation7 + $0x174] ss:$8 sps:$4 sm:$0xff]   ;;  %v4353_v17 = vld [vmem:[#allocation8 + $0xb0] ss:$8 sps:$4 sm:$0xff]  }
 0x2b1   :  { %v1010_v31 = vsel %vm197_vm0, %v1006_v23, %v1003_v8  ;;  %v1007_v32 = vsel %vm197_vm0, %v1005_v18, %v1006_v23  ;;  %v5123_v33 = vsel %vm218_vm5, %v1017_v21, %v1018_v25  ;;  %v5127_v34 = vsel %vm218_vm5, %v1018_v25, %v1015_v19  ;;  %v4355_v16 = vld [vmem:[#allocation8 + $0xb4] ss:$8 sps:$4 sm:$0xff]   ;;  %v4359_v20 = vld [vmem:[#allocation8 + $0xd0] ss:$8 sps:$4 sm:$0xff]  }
 0x2b2   :  { %v1009_v35 = vsel %vm197_vm0, %v1003_v8, %v1004_v28  ;;  %v5133_v37 = vsel %vm218_vm5, %v1016_v29, %v1017_v21  ;;  %v5137_v38 = vsel %vm218_vm5, %v1015_v19, %v1016_v29  ;;  %v1008_v41 = vsel %vm197_vm0, %v1004_v28, %v1005_v18  ;;  %1855 = vmatprep.subr.bf16.mxu1 %v4355_v16  ;;  %v4358_v18 = vld [vmem:[#allocation8 + $0xc4] ss:$8 sps:$4 sm:$0xff]   ;;  %v4356_v8 = vld [vmem:[#allocation8 + $0xc0] ss:$8 sps:$4 sm:$0xff]   ;;  %v4361_v19 = vld [vmem:[#allocation8 + $0xd4] ss:$8 sps:$4 sm:$0xff]  }
 0x2b3   :  { %v3659_v42 = vpack.c.bf16 %v5133_v37, %v5137_v38  ;;  %v3621_v43 = vpack.c.bf16 %v1009_v35, %v1010_v31  ;;  %v3624_v46 = vpack.c.bf16 %v1007_v32, %v1008_v41  ;;  %v3662_v47 = vpack.c.bf16 %v5127_v34, %v5123_v33  ;;  %1856 = vmatpush1.bf16.msra.mxu1 %v4353_v17  ;;  %v4364_v21 = vld [vmem:[#allocation8 + $0xe4] ss:$8 sps:$4 sm:$0xff]   ;;  %v4367_v23 = vld [vmem:[#allocation8 + $0xf4] ss:$8 sps:$4 sm:$0xff]   ;;  %v4365_v25 = vld [vmem:[#allocation8 + $0xf0] ss:$8 sps:$4 sm:$0xff]  }
 0x2b4   :  { %1857 = vmatprep.subr.bf16.mxu1 %v4358_v18  ;;  %v1490_v28 = vld [vmem:[%s5495_s8] sm:$0xf]  ;;  %v5171_v29 = vsub.s32 2, %v4961_v4 }
 0x2b5   :  { %3622 = vmatmul.mubr.msk.bf16.vlgmr.msra.gmra.mrb[4].mxu0 %vm4992_vm3, %v3621_v43  ;;  %v1495_v31 = vrot.slane %v1490_v28, %v5061_v24  ;;  %v1521_v33 = vrot.slane %v1490_v28, %v5067_v26 }
 0x2b6   :  { %1278 = vmatpush1.bf16.msra.mxu0 %v4272_v40  ;;  %1186 = vmatprep.mubr.bf16.mxu0 %v4799_v36  ;;  %v1499_v32 = vrot.slane %v1490_v28, %v5171_v29 }
 0x2b7   :  { %1279 = vmatprep.subr.bf16.mxu0 %v4277_v44  ;;  %1858 = vmatpush1.bf16.msra.mxu1 %v4356_v8  ;;  %v1505_v35 = vrot.slane %v1495_v31, %v5061_v24  ;;  %v1531_v38 = vrot.slane %v1521_v33, %v5067_v26 }
 0x2b8   :  { %1859 = vmatprep.subr.bf16.mxu1 %v4361_v19  ;;  %v1509_v37 = vrot.slane %v1499_v32, %v5061_v24 }
 0x2ba   :  { %1280 = vmatpush1.bf16.msra.mxu0 %v4275_v48 }
 0x2bb   :  { %1281 = vmatprep.subr.bf16.mxu0 %v4280_v49  ;;  %1860 = vmatpush1.bf16.msra.mxu1 %v4359_v20 }
 0x2bc   :  { %1861 = vmatprep.subr.bf16.mxu1 %v4364_v21 }
 0x2bd   :  { %3625 = vmatmul.mubr.msk.bf16.gmra.mrb[8].mxu0 %vm5026_vm8, %v3624_v46 }
 0x2be   :  { %1282 = vmatpush1.bf16.msra.mxu0 %v4278_v50  ;;  %1309 = vmatprep.mubr.bf16.mxu0 %v4799_v36 }
 0x2bf   :  { %1283 = vmatprep.subr.bf16.mxu0 %v4283_v51 }
 0x2c2   :  { %1284 = vmatpush1.bf16.msra.mxu0 %v4281_v52 }
 0x2c3   :  { %1285 = vmatprep.subr.bf16.mxu0 %v4286_v53 }
 0x2c6   :  { %1286 = vmatpush1.bf16.msra.mxu0 %v4284_v54 }
 0x2c7   :  { %1287 = vmatprep.subr.bf16.mxu0 %v4289_v55 }
 0x2ca   :  { %1288 = vmatpush1.bf16.msra.mxu0 %v4287_v56 }
 0x2cb   :  { %1289 = vmatprep.subr.bf16.mxu0 %v4292_v57 }
 0x2ce   :  { %1290 = vmatpush1.bf16.msra.mxu0 %v4290_v58 }
 0x2cf   :  { %1291 = vmatprep.subr.bf16.mxu0 %v4295_v59 }
 0x2d2   :  { %1292 = vmatpush1.bf16.msra.mxu0 %v4293_v60 }
 0x2d3   :  { %1429 = vmatprep.subr.bf16.mxu0 %v4298_v61 }
 0x2d5   :  { %1310 = vmatmul.mubr.bf16.vlgmr.msra.gmra.mrb[4].mxu0 %v1027_v30  ;;  %v5174_v30 = vsub.s32 3, %v4961_v4  ;;  %v4520_v4 = vld [vmem:[#allocation10 + $0x124] ss:$8 sps:$4 sm:$0xff]  }
 0x2d6   :  { %1430 = vmatpush1.bf16.msra.mxu0 %v4296_v63  ;;  %1319 = vmatprep.mubr.bf16.mxu0 %v4799_v36 }
 0x2d7   :  { %1431 = vmatprep.subr.bf16.mxu0 %v4301_v0  ;;  %v1525_v34 = vrot.slane %v1490_v28, %v5174_v30 }
 0x2d9   :  { %v1535_v41 = vrot.slane %v1525_v34, %v5067_v26 }
 0x2da   :  { %1432 = vmatpush1.bf16.msra.mxu0 %v4299_v1 }
 0x2db   :  { %1433 = vmatprep.subr.bf16.mxu0 %v4304_v2 }
 0x2dd   :  { %1320 = vmatmul.mubr.bf16.gmra.mrb[8].mxu0 %v1028_v27  ;;  %v4370_v27 = vld [vmem:[#allocation8 + $0x104] ss:$8 sps:$4 sm:$0xff]  }
 0x2de   :  { %1434 = vmatpush1.bf16.msra.mxu0 %v4302_v3  ;;  %1461 = vmatprep.mubr.bf16.mxu0 %v4799_v36 }
 0x2df   :  { %1435 = vmatprep.subr.bf16.mxu0 %v4307_v5 }
 0x2e2   :  { %1436 = vmatpush1.bf16.msra.mxu0 %v4305_v6 }
 0x2e3   :  { %1437 = vmatprep.subr.bf16.mxu0 %v4310_v7 }
 0x2e6   :  { %1438 = vmatpush1.bf16.msra.mxu0 %v4308_v9 }
 0x2e7   :  { %1439 = vmatprep.subr.bf16.mxu0 %v4313_v10 }
 0x2ea   :  { %1440 = vmatpush1.bf16.msra.mxu0 %v4311_v11 }
 0x2eb   :  { %1441 = vmatprep.subr.bf16.mxu0 %v4316_v12 }
 0x2ee   :  { %1442 = vmatpush1.bf16.msra.mxu0 %v4314_v14 }
 0x2ef   :  { %1443 = vmatprep.subr.bf16.mxu0 %v4319_v15 }
 0x2f2   :  { %1444 = vmatpush1.bf16.msra.mxu0 %v4317_v13 }
 0x2f5   :  { %3660 = vmatmul.mubr.msk.bf16.vlgmr.msra.gmra.mrb[4].mxu0 %vm5011_vm7, %v3659_v42 }
 0x2f6   :  { %1471 = vmatprep.mubr.bf16.mxu0 %v4799_v36  ;;  %v4362_v36 = vld [vmem:[#allocation8 + $0xe0] ss:$8 sps:$4 sm:$0xff]  }
 0x2f7   :  { %1862 = vmatpush1.bf16.msra.mxu1 %v4362_v36 }
 0x2f8   :  { %1863 = vmatprep.subr.bf16.mxu1 %v4367_v23 }
 0x2fb   :  { %1864 = vmatpush1.bf16.msra.mxu1 %v4365_v25 }
 0x2fc   :  { %2046 = vmatprep.subr.bf16.mxu1 %v4370_v27 }
 0x2fd   :  { %3663 = vmatmul.mubr.msk.bf16.gmra.mrb[8].mxu0 %vm5043_vm10, %v3662_v47 }
 0x3c8   :  { %v1463_v40 = vpop.f32.mrb[4].mxu0 }
 0x3c9   :  { %v1510_v42 = vmul.f32 %v1505_v35, %v1463_v40  ;;  %v1465_v43 = vpop.f32.mrb[5].mxu0 }
 0x3ca   :  { %v1511_v44 = vmul.f32 %v1509_v37, %v1465_v43  ;;  %v1467_v46 = vpop.f32.mrb[6].mxu0 }
 0x3cb   :  { %v1536_v47 = vadd.f32 %v1531_v38, %v1510_v42  ;;  %v1512_v48 = vmul.f32 %v1505_v35, %v1467_v46  ;;  %v1469_v49 = vpop.f32.mrb[7].mxu0 }
 0x3cc   :  { %v1537_v50 = vadd.f32 %v1535_v41, %v1511_v44  ;;  %v1513_v51 = vmul.f32 %v1509_v37, %v1469_v49 }
 0x3cd   :  { %v5184_v52 = vmax.f32 %v1536_v47, 0.0  ;;  %v1538_v53 = vadd.f32 %v1531_v38, %v1512_v48 }
 0x3ce   :  { %v5186_v54 = vmax.f32 %v1537_v50, 0.0  ;;  %v1539_v55 = vadd.f32 %v1535_v41, %v1513_v51 }
 0x3cf   :  { %v1552_v56 = vrot.slane %v5184_v52, 7  ;;  %v5189_v57 = vmax.f32 %v1538_v53, 0.0  ;;  %v1576_v58 = vrot.slane %v5184_v52, 1 }
 0x3d0   :  { %v1553_v59 = vrot.slane %v5186_v54, 7  ;;  %v1577_v60 = vrot.slane %v5186_v54, 1  ;;  %v5194_v61 = vmax.f32 %v1539_v55, 0.0  ;;  %v1473_v63 = vpop.f32.mrb[8].mxu0  ;;  %v4368_v55 = vld [vmem:[#allocation8 + $0x100] ss:$8 sps:$4 sm:$0xff]  }
 0x3d1   :  { %v1554_v0 = vrot.slane %v5189_v57, 7  ;;  %v1578_v1 = vrot.slane %v5189_v57, 1  ;;  %v1600_v2 = vpack.c.bf16 %v5189_v57, %v5184_v52  ;;  %v1514_v3 = vmul.f32 %v1505_v35, %v1473_v63  ;;  %v1475_v5 = vpop.f32.mrb[9].mxu0  ;;  %v4425_v52 = vld [vmem:[#allocation8 + $0x230] ss:$8 sps:$4 sm:$0xff]  }
 0x3d2   :  { %v1555_v6 = vrot.slane %v5194_v61, 7  ;;  %v1579_v7 = vrot.slane %v5194_v61, 1  ;;  %v1515_v9 = vmul.f32 %v1509_v37, %v1475_v5  ;;  %v1477_v10 = vpop.f32.mrb[10].mxu0  ;;  %v1601_v11 = vpack.c.bf16 %v5194_v61, %v5186_v54  ;;  %v4430_v57 = vld [vmem:[#allocation8 + $0x244] ss:$8 sps:$4 sm:$0xff]  }
 0x3d3   :  { %v1564_v12 = vsel %vm197_vm0, %v1552_v56, %v1554_v0  ;;  %v5208_v14 = vsel %vm218_vm5, %v1576_v58, %v1578_v1  ;;  %v1540_v15 = vadd.f32 %v1531_v38, %v1514_v3  ;;  %v1516_v13 = vmul.f32 %v1505_v35, %v1477_v10  ;;  %v1479_v16 = vpop.f32.mrb[11].mxu0  ;;  %v4379_v10 = vld [vmem:[#allocation8 + $0x134] ss:$8 sps:$4 sm:$0xff]  }
 0x3d4   :  { %v1541_v17 = vadd.f32 %v1535_v41, %v1515_v9  ;;  %v1517_v18 = vmul.f32 %v1509_v37, %v1479_v16  ;;  %v1565_v8 = vsel %vm197_vm0, %v1553_v59, %v1555_v6  ;;  %v5214_v19 = vsel %vm218_vm5, %v1577_v60, %v1579_v7  ;;  %v4374_v9 = vld [vmem:[#allocation8 + $0x120] ss:$8 sps:$4 sm:$0xff]   ;;  %v4469_v16 = vld [vmem:[#allocation10 + $0x14] ss:$8 sps:$4 sm:$0xff]  }
 0x3d5   :  { %v5216_v20 = vmax.f32 %v1540_v15, 0.0  ;;  %v1542_v21 = vadd.f32 %v1531_v38, %v1516_v13  ;;  %v4466_v15 = vld [vmem:[#allocation10 + $0x4] ss:$8 sps:$4 sm:$0xff]   ;;  %v4377_v13 = vld [vmem:[#allocation8 + $0x130] ss:$8 sps:$4 sm:$0xff]  }
 0x3d6   :  { %v5218_v36 = vmax.f32 %v1541_v17, 0.0  ;;  %v1543_v23 = vadd.f32 %v1535_v41, %v1517_v18  ;;  %v4382_v17 = vld [vmem:[#allocation8 + $0x144] ss:$8 sps:$4 sm:$0xff]   ;;  %2700 = vmatprep.subr.bf16.mxu0 %v4466_v15  ;;  %v4467_v18 = vld [vmem:[#allocation10 + $0x10] ss:$8 sps:$4 sm:$0xff]  }
 0x3d7   :  { %v1556_v25 = vrot.slane %v5216_v20, 7  ;;  %v1580_v27 = vrot.slane %v5216_v20, 1  ;;  %v5222_v28 = vmax.f32 %v1542_v21, 0.0  ;;  %v4380_v21 = vld [vmem:[#allocation8 + $0x140] ss:$8 sps:$4 sm:$0xff]  }
 0x3d8   :  { %v1557_v31 = vrot.slane %v5218_v36, 7  ;;  %v1581_v32 = vrot.slane %v5218_v36, 1  ;;  %v5226_v33 = vmax.f32 %v1543_v23, 0.0  ;;  %v4385_v23 = vld [vmem:[#allocation8 + $0x154] ss:$8 sps:$4 sm:$0xff]  }
 0x3d9   :  { %v5230_v34 = vsel %vm218_vm5, %v1578_v1, %v1580_v27  ;;  %v1558_v35 = vrot.slane %v5222_v28, 7  ;;  %v1582_v37 = vrot.slane %v5222_v28, 1  ;;  %v1562_v38 = vsel %vm197_vm0, %v1554_v0, %v1556_v25  ;;  %v4373_v0 = vld [vmem:[#allocation8 + $0x114] ss:$8 sps:$4 sm:$0xff]   ;;  %v4401_v15 = vld [vmem:[#allocation8 + $0x1b0] ss:$8 sps:$4 sm:$0xff]  }
 0x3da   :  { %v3776_v40 = vpack.c.bf16 %v5230_v34, %v5208_v14  ;;  %v1559_v41 = vrot.slane %v5226_v33, 7  ;;  %v1583_v42 = vrot.slane %v5226_v33, 1  ;;  %v1563_v43 = vsel %vm197_vm0, %v1555_v6, %v1557_v31  ;;  %v4502_v14 = vld [vmem:[#allocation10 + $0xc4] ss:$8 sps:$4 sm:$0xff]   ;;  %v4500_v34 = vld [vmem:[#allocation10 + $0xc0] ss:$8 sps:$4 sm:$0xff]  }
 0x3db   :  { %v1566_v44 = vsel %vm197_vm0, %v1558_v35, %v1552_v56  ;;  %v1560_v46 = vsel %vm197_vm0, %v1556_v25, %v1558_v35  ;;  %v1603_v47 = vpack.c.bf16 %v5226_v33, %v5218_v36  ;;  %v1602_v48 = vpack.c.bf16 %v5222_v28, %v5216_v20  ;;  %v4470_v25 = vld [vmem:[#allocation10 + $0x20] ss:$8 sps:$4 sm:$0xff]   ;;  %v4478_v35 = vld [vmem:[#allocation10 + $0x44] ss:$8 sps:$4 sm:$0xff]   ;;  %v4433_v36 = vld [vmem:[#allocation8 + $0x254] ss:$8 sps:$4 sm:$0xff]  }
 0x3dc   :  { %v1567_v49 = vsel %vm197_vm0, %v1559_v41, %v1553_v59  ;;  %v3700_v50 = vpack.c.bf16 %v1564_v12, %v1566_v44  ;;  %v1561_v51 = vsel %vm197_vm0, %v1557_v31, %v1559_v41  ;;  %v3706_v53 = vpack.c.bf16 %v1560_v46, %v1562_v38  ;;  %v4464_v12 = vld [vmem:[#allocation10] ss:$8 sps:$4 sm:$0xff]   ;;  %v4383_v31 = vld [vmem:[#allocation8 + $0x150] ss:$8 sps:$4 sm:$0xff]   ;;  %v4391_v38 = vld [vmem:[#allocation8 + $0x174] ss:$8 sps:$4 sm:$0xff]  }
 0x3dd   :  { %v3697_v54 = vpack.c.bf16 %v1565_v8, %v1567_v49  ;;  %v3703_v56 = vpack.c.bf16 %v1561_v51, %v1563_v43  ;;  %v5256_v61 = vsel %vm218_vm5, %v1579_v7, %v1581_v32  ;;  %v5260_v63 = vsel %vm218_vm5, %v1581_v32, %v1583_v42  ;;  %2701 = vmatpush1.bf16.msra.mxu0 %v4464_v12  ;;  %v4472_v8 = vld [vmem:[#allocation10 + $0x24] ss:$8 sps:$4 sm:$0xff]   ;;  %v4473_v32 = vld [vmem:[#allocation10 + $0x30] ss:$8 sps:$4 sm:$0xff]   ;;  %v4476_v41 = vld [vmem:[#allocation10 + $0x40] ss:$8 sps:$4 sm:$0xff]  }
 0x3de   :  { %v3773_v59 = vpack.c.bf16 %v5256_v61, %v5214_v19  ;;  %v5266_v1 = vsel %vm218_vm5, %v1583_v42, %v1577_v60  ;;  %v5270_v3 = vsel %vm218_vm5, %v1580_v27, %v1582_v37  ;;  %v5274_v5 = vsel %vm218_vm5, %v1582_v37, %v1576_v58  ;;  %v4371_v60 = vld [vmem:[#allocation8 + $0x110] ss:$8 sps:$4 sm:$0xff]   ;;  %v4376_v58 = vld [vmem:[#allocation8 + $0x124] ss:$8 sps:$4 sm:$0xff]   ;;  %2702 = vmatprep.subr.bf16.mxu0 %v4469_v16  ;;  %v4475_v27 = vld [vmem:[#allocation10 + $0x34] ss:$8 sps:$4 sm:$0xff]  }
 0x3df   :  { %3698 = vmatprep.mubr.msk.bf16.mxu1 %vm4992_vm3, %v3697_v54  ;;  %v3779_v6 = vpack.c.bf16 %v5266_v1, %v5260_v63  ;;  %v3782_v7 = vpack.c.bf16 %v5274_v5, %v5270_v3  ;;  %v4386_v37 = vld [vmem:[#allocation8 + $0x160] ss:$8 sps:$4 sm:$0xff]   ;;  %v4481_v42 = vld [vmem:[#allocation10 + $0x54] ss:$8 sps:$4 sm:$0xff]   ;;  %v4389_v43 = vld [vmem:[#allocation8 + $0x170] ss:$8 sps:$4 sm:$0xff]  }
 0x3e0   :  { %3701 = vmatmul.mubr.msk.bf16.vlgmr.msra.gmra.mrb[8].mxu1 %vm4992_vm3, %v3700_v50  ;;  %v4394_v44 = vld [vmem:[#allocation8 + $0x184] ss:$8 sps:$4 sm:$0xff]   ;;  %v4479_v46 = vld [vmem:[#allocation10 + $0x50] ss:$8 sps:$4 sm:$0xff]   ;;  %v4392_v50 = vld [vmem:[#allocation8 + $0x180] ss:$8 sps:$4 sm:$0xff]  }
 0x3e1   :  { %2047 = vmatpush1.bf16.msra.mxu1 %v4368_v55  ;;  %3704 = vmatprep.mubr.msk.bf16.mxu1 %vm5026_vm8, %v3703_v56  ;;  %v4484_v49 = vld [vmem:[#allocation10 + $0x64] ss:$8 sps:$4 sm:$0xff]   ;;  %v4397_v51 = vld [vmem:[#allocation8 + $0x194] ss:$8 sps:$4 sm:$0xff]   ;;  %v4395_v55 = vld [vmem:[#allocation8 + $0x190] ss:$8 sps:$4 sm:$0xff]  }
 0x3e2   :  { %2048 = vmatprep.subr.bf16.mxu1 %v4373_v0  ;;  %2703 = vmatpush1.bf16.msra.mxu0 %v4467_v18  ;;  %v4487_v54 = vld [vmem:[#allocation10 + $0x74] ss:$8 sps:$4 sm:$0xff]   ;;  %v4400_v56 = vld [vmem:[#allocation8 + $0x1a4] ss:$8 sps:$4 sm:$0xff]   ;;  %v4485_v0 = vld [vmem:[#allocation10 + $0x70] ss:$8 sps:$4 sm:$0xff]  }
 0x3e3   :  { %2704 = vmatprep.subr.bf16.mxu0 %v4472_v8  ;;  %v4493_v12 = vld [vmem:[#allocation10 + $0x94] ss:$8 sps:$4 sm:$0xff]   ;;  %v4491_v16 = vld [vmem:[#allocation10 + $0x90] ss:$8 sps:$4 sm:$0xff]   ;;  %v4404_v18 = vld [vmem:[#allocation8 + $0x1c0] ss:$8 sps:$4 sm:$0xff]  }
 0x3e4   :  { %v4409_v8 = vld [vmem:[#allocation8 + $0x1d4] ss:$8 sps:$4 sm:$0xff]   ;;  %v4431_v33 = vld [vmem:[#allocation8 + $0x250] ss:$8 sps:$4 sm:$0xff]   ;;  %v4434_v20 = vld [vmem:[#allocation8 + $0x260] ss:$8 sps:$4 sm:$0xff]  }
 0x3e5   :  { %2049 = vmatpush1.bf16.msra.mxu1 %v4371_v60  ;;  %v4490_v60 = vld [vmem:[#allocation10 + $0x84] ss:$8 sps:$4 sm:$0xff]   ;;  %v4439_v28 = vld [vmem:[#allocation8 + $0x274] ss:$8 sps:$4 sm:$0xff]   ;;  %v4437_v19 = vld [vmem:[#allocation8 + $0x270] ss:$8 sps:$4 sm:$0xff]  }
 0x3e6   :  { %2050 = vmatprep.subr.bf16.mxu1 %v4376_v58  ;;  %2705 = vmatpush1.bf16.msra.mxu0 %v4470_v25  ;;  %v4398_v58 = vld [vmem:[#allocation8 + $0x1a0] ss:$8 sps:$4 sm:$0xff]   ;;  %v4412_v25 = vld [vmem:[#allocation8 + $0x1e4] ss:$8 sps:$4 sm:$0xff]   ;;  %v4511_v3 = vld [vmem:[#allocation10 + $0xf4] ss:$8 sps:$4 sm:$0xff]  }
 0x3e7   :  { %2706 = vmatprep.subr.bf16.mxu0 %v4475_v27  ;;  %v4410_v27 = vld [vmem:[#allocation8 + $0x1e0] ss:$8 sps:$4 sm:$0xff]   ;;  %v4508_v63 = vld [vmem:[#allocation10 + $0xe4] ss:$8 sps:$4 sm:$0xff]   ;;  %v4509_v5 = vld [vmem:[#allocation10 + $0xf0] ss:$8 sps:$4 sm:$0xff]  }
 0x3e8   :  { %3707 = vmatmul.mubr.msk.bf16.gmra.mrb[12].mxu1 %vm5026_vm8, %v3706_v53  ;;  %v4482_v53 = vld [vmem:[#allocation10 + $0x60] ss:$8 sps:$4 sm:$0xff]  }
 0x3e9   :  { %2051 = vmatpush1.bf16.msra.mxu1 %v4374_v9  ;;  %2078 = vmatprep.mubr.bf16.mxu1 %v1601_v11  ;;  %v4388_v11 = vld [vmem:[#allocation8 + $0x164] ss:$8 sps:$4 sm:$0xff]   ;;  %v4403_v9 = vld [vmem:[#allocation8 + $0x1b4] ss:$8 sps:$4 sm:$0xff]   ;;  %v4440_v61 = vld [vmem:[#allocation8 + $0x280] ss:$8 sps:$4 sm:$0xff]  }
 0x3ea   :  { %2052 = vmatprep.subr.bf16.mxu1 %v4379_v10  ;;  %2707 = vmatpush1.bf16.msra.mxu0 %v4473_v32  ;;  %v4488_v10 = vld [vmem:[#allocation10 + $0x80] ss:$8 sps:$4 sm:$0xff]   ;;  %v4418_v32 = vld [vmem:[#allocation8 + $0x204] ss:$8 sps:$4 sm:$0xff]  }
 0x3eb   :  { %2708 = vmatprep.subr.bf16.mxu0 %v4478_v35  ;;  %v4416_v35 = vld [vmem:[#allocation8 + $0x200] ss:$8 sps:$4 sm:$0xff]  }
 0x3ec   :  { %v4506_v1 = vld [vmem:[#allocation10 + $0xe0] ss:$8 sps:$4 sm:$0xff]  }
 0x3ed   :  { %2053 = vmatpush1.bf16.msra.mxu1 %v4377_v13  ;;  %v4406_v13 = vld [vmem:[#allocation8 + $0x1c4] ss:$8 sps:$4 sm:$0xff]  }
 0x3ee   :  { %2054 = vmatprep.subr.bf16.mxu1 %v4382_v17  ;;  %2709 = vmatpush1.bf16.msra.mxu0 %v4476_v41  ;;  %v4496_v17 = vld [vmem:[#allocation10 + $0xa4] ss:$8 sps:$4 sm:$0xff]  }
 0x3ef   :  { %2710 = vmatprep.subr.bf16.mxu0 %v4481_v42  ;;  %v4424_v41 = vld [vmem:[#allocation8 + $0x224] ss:$8 sps:$4 sm:$0xff]   ;;  %v4422_v42 = vld [vmem:[#allocation8 + $0x220] ss:$8 sps:$4 sm:$0xff]  }
 0x3f1   :  { %2055 = vmatpush1.bf16.msra.mxu1 %v4380_v21  ;;  %v4494_v21 = vld [vmem:[#allocation10 + $0xa0] ss:$8 sps:$4 sm:$0xff]  }
 0x3f2   :  { %2056 = vmatprep.subr.bf16.mxu1 %v4385_v23  ;;  %2711 = vmatpush1.bf16.msra.mxu0 %v4479_v46  ;;  %v4407_v23 = vld [vmem:[#allocation8 + $0x1d0] ss:$8 sps:$4 sm:$0xff]   ;;  %v4448_v46 = vld [vmem:[#allocation8 + $0x2a4] ss:$8 sps:$4 sm:$0xff]  }
 0x3f3   :  { %2712 = vmatprep.subr.bf16.mxu0 %v4484_v49  ;;  %v4446_v49 = vld [vmem:[#allocation8 + $0x2a0] ss:$8 sps:$4 sm:$0xff]  }
 0x3f5   :  { %2057 = vmatpush1.bf16.msra.mxu1 %v4383_v31  ;;  %v4415_v31 = vld [vmem:[#allocation8 + $0x1f4] ss:$8 sps:$4 sm:$0xff]  }
 0x3f6   :  { %2058 = vmatprep.subr.bf16.mxu1 %v4388_v11  ;;  %2713 = vmatpush1.bf16.msra.mxu0 %v4482_v53  ;;  %v4413_v11 = vld [vmem:[#allocation8 + $0x1f0] ss:$8 sps:$4 sm:$0xff]   ;;  %v4454_v53 = vld [vmem:[#allocation8 + $0x2c4] ss:$8 sps:$4 sm:$0xff]  }
 0x3f7   :  { %2714 = vmatprep.subr.bf16.mxu0 %v4487_v54  ;;  %v4452_v54 = vld [vmem:[#allocation8 + $0x2c0] ss:$8 sps:$4 sm:$0xff]  }
 0x3f9   :  { %2059 = vmatpush1.bf16.msra.mxu1 %v4386_v37  ;;  %v4421_v37 = vld [vmem:[#allocation8 + $0x214] ss:$8 sps:$4 sm:$0xff]  }
 0x3fa   :  { %2060 = vmatprep.subr.bf16.mxu1 %v4391_v38  ;;  %2715 = vmatpush1.bf16.msra.mxu0 %v4485_v0  ;;  %v4419_v38 = vld [vmem:[#allocation8 + $0x210] ss:$8 sps:$4 sm:$0xff]   ;;  %v4460_v0 = vld [vmem:[#allocation8 + $0x2e4] ss:$8 sps:$4 sm:$0xff]  }
 0x3fb   :  { %2716 = vmatprep.subr.bf16.mxu0 %v4490_v60  ;;  %v4458_v60 = vld [vmem:[#allocation8 + $0x2e0] ss:$8 sps:$4 sm:$0xff]  }
 0x3fd   :  { %2061 = vmatpush1.bf16.msra.mxu1 %v4389_v43  ;;  %v4427_v43 = vld [vmem:[#allocation8 + $0x234] ss:$8 sps:$4 sm:$0xff]  }
 0x3fe   :  { %2062 = vmatprep.subr.bf16.mxu1 %v4394_v44  ;;  %2717 = vmatpush1.bf16.msra.mxu0 %v4488_v10  ;;  %v4443_v44 = vld [vmem:[#allocation8 + $0x290] ss:$8 sps:$4 sm:$0xff]   ;;  %v4499_v10 = vld [vmem:[#allocation10 + $0xb4] ss:$8 sps:$4 sm:$0xff]  }
 0x3ff   :  { %2718 = vmatprep.subr.bf16.mxu0 %v4493_v12  ;;  %v4497_v12 = vld [vmem:[#allocation10 + $0xb0] ss:$8 sps:$4 sm:$0xff]  }
 0x401   :  { %2063 = vmatpush1.bf16.msra.mxu1 %v4392_v50  ;;  %v4451_v50 = vld [vmem:[#allocation8 + $0x2b4] ss:$8 sps:$4 sm:$0xff]  }
 0x402   :  { %2064 = vmatprep.subr.bf16.mxu1 %v4397_v51  ;;  %2719 = vmatpush1.bf16.msra.mxu0 %v4491_v16  ;;  %v4449_v51 = vld [vmem:[#allocation8 + $0x2b0] ss:$8 sps:$4 sm:$0xff]  }
 0x403   :  { %2720 = vmatprep.subr.bf16.mxu0 %v4496_v17 }
 0x405   :  { %2065 = vmatpush1.bf16.msra.mxu1 %v4395_v55  ;;  %v4457_v55 = vld [vmem:[#allocation8 + $0x2d4] ss:$8 sps:$4 sm:$0xff]  }
 0x406   :  { %2066 = vmatprep.subr.bf16.mxu1 %v4400_v56  ;;  %2721 = vmatpush1.bf16.msra.mxu0 %v4494_v21  ;;  %v4455_v56 = vld [vmem:[#allocation8 + $0x2d0] ss:$8 sps:$4 sm:$0xff]  }
 0x407   :  { %2722 = vmatprep.subr.bf16.mxu0 %v4499_v10 }
 0x409   :  { %2067 = vmatpush1.bf16.msra.mxu1 %v4398_v58  ;;  %v4463_v58 = vld [vmem:[#allocation8 + $0x2f4] ss:$8 sps:$4 sm:$0xff]  }
 0x40a   :  { %2068 = vmatprep.subr.bf16.mxu1 %v4403_v9  ;;  %v4461_v9 = vld [vmem:[#allocation8 + $0x2f0] ss:$8 sps:$4 sm:$0xff]   ;;  %2723 = vmatpush1.bf16.msra.mxu0 %v4497_v12 }
 0x40b   :  { %2724 = vmatprep.subr.bf16.mxu0 %v4502_v14 }
 0x40d   :  { %2069 = vmatpush1.bf16.msra.mxu1 %v4401_v15  ;;  %v4503_v15 = vld [vmem:[#allocation10 + $0xd0] ss:$8 sps:$4 sm:$0xff]  }
 0x40e   :  { %2070 = vmatprep.subr.bf16.mxu1 %v4406_v13  ;;  %2725 = vmatpush1.bf16.msra.mxu0 %v4500_v34 }
 0x411   :  { %2071 = vmatpush1.bf16.msra.mxu1 %v4404_v18 }
 0x412   :  { %2072 = vmatprep.subr.bf16.mxu1 %v4409_v8 }
 0x415   :  { %2073 = vmatpush1.bf16.msra.mxu1 %v4407_v23 }
 0x416   :  { %2074 = vmatprep.subr.bf16.mxu1 %v4412_v25 }
 0x419   :  { %2075 = vmatpush1.bf16.msra.mxu1 %v4410_v27 }
 0x41a   :  { %2076 = vmatprep.subr.bf16.mxu1 %v4415_v31 }
 0x41d   :  { %2077 = vmatpush1.bf16.msra.mxu1 %v4413_v11 }
 0x41e   :  { %2296 = vmatprep.subr.bf16.mxu1 %v4418_v32 }
 0x420   :  { %2079 = vmatmul.mubr.bf16.vlgmr.msra.gmra.mrb[8].mxu1 %v1600_v2  ;;  %v4428_v2 = vld [vmem:[#allocation8 + $0x240] ss:$8 sps:$4 sm:$0xff]  }
 0x421   :  { %2088 = vmatprep.mubr.bf16.mxu1 %v1603_v47  ;;  %2297 = vmatpush1.bf16.msra.mxu1 %v4416_v35  ;;  %v4436_v47 = vld [vmem:[#allocation8 + $0x264] ss:$8 sps:$4 sm:$0xff]  }
 0x422   :  { %2298 = vmatprep.subr.bf16.mxu1 %v4421_v37 }
 0x425   :  { %2299 = vmatpush1.bf16.msra.mxu1 %v4419_v38 }
 0x426   :  { %2300 = vmatprep.subr.bf16.mxu1 %v4424_v41 }
 0x428   :  { %2089 = vmatmul.mubr.bf16.gmra.mrb[12].mxu1 %v1602_v48  ;;  %v4442_v48 = vld [vmem:[#allocation8 + $0x284] ss:$8 sps:$4 sm:$0xff]  }
 0x429   :  { %2301 = vmatpush1.bf16.msra.mxu1 %v4422_v42  ;;  %3774 = vmatprep.mubr.msk.bf16.mxu1 %vm5011_vm7, %v3773_v59  ;;  %v4445_v59 = vld [vmem:[#allocation8 + $0x294] ss:$8 sps:$4 sm:$0xff]  }
 0x42a   :  { %2302 = vmatprep.subr.bf16.mxu1 %v4427_v43 }
 0x42d   :  { %2303 = vmatpush1.bf16.msra.mxu1 %v4425_v52 }
 0x42e   :  { %2304 = vmatprep.subr.bf16.mxu1 %v4430_v57 }
 0x431   :  { %2305 = vmatpush1.bf16.msra.mxu1 %v4428_v2 }
 0x432   :  { %2306 = vmatprep.subr.bf16.mxu1 %v4433_v36 }
 0x435   :  { %2307 = vmatpush1.bf16.msra.mxu1 %v4431_v33 }
 0x436   :  { %2308 = vmatprep.subr.bf16.mxu1 %v4436_v47 }
 0x439   :  { %2309 = vmatpush1.bf16.msra.mxu1 %v4434_v20 }
 0x43a   :  { %2310 = vmatprep.subr.bf16.mxu1 %v4439_v28 }
 0x43d   :  { %2311 = vmatpush1.bf16.msra.mxu1 %v4437_v19 }
 0x43e   :  { %2312 = vmatprep.subr.bf16.mxu1 %v4442_v48 }
 0x441   :  { %2313 = vmatpush1.bf16.msra.mxu1 %v4440_v61 }
 0x442   :  { %2314 = vmatprep.subr.bf16.mxu1 %v4445_v59 }
 0x445   :  { %2315 = vmatpush1.bf16.msra.mxu1 %v4443_v44 }
 0x446   :  { %2316 = vmatprep.subr.bf16.mxu1 %v4448_v46 }
 0x449   :  { %2317 = vmatpush1.bf16.msra.mxu1 %v4446_v49 }
 0x44a   :  { %2318 = vmatprep.subr.bf16.mxu1 %v4451_v50 }
 0x44d   :  { %2319 = vmatpush1.bf16.msra.mxu1 %v4449_v51 }
 0x44e   :  { %2320 = vmatprep.subr.bf16.mxu1 %v4454_v53 }
 0x451   :  { %2321 = vmatpush1.bf16.msra.mxu1 %v4452_v54 }
 0x452   :  { %2322 = vmatprep.subr.bf16.mxu1 %v4457_v55 }
 0x455   :  { %2323 = vmatpush1.bf16.msra.mxu1 %v4455_v56 }
 0x456   :  { %2324 = vmatprep.subr.bf16.mxu1 %v4460_v0 }
 0x459   :  { %2325 = vmatpush1.bf16.msra.mxu1 %v4458_v60 }
 0x45a   :  { %2326 = vmatprep.subr.bf16.mxu1 %v4463_v58 }
 0x45d   :  { %2327 = vmatpush1.bf16.msra.mxu1 %v4461_v9 }
 0x460   :  { %3777 = vmatmul.mubr.msk.bf16.vlgmr.msra.gmra.mrb[8].mxu1 %vm5011_vm7, %v3776_v40  ;;  %v4505_v40 = vld [vmem:[#allocation10 + $0xd4] ss:$8 sps:$4 sm:$0xff]  }
 0x461   :  { %3780 = vmatprep.mubr.msk.bf16.mxu1 %vm5043_vm10, %v3779_v6  ;;  %2726 = vmatprep.subr.bf16.mxu0 %v4505_v40  ;;  %v4514_v6 = vld [vmem:[#allocation10 + $0x104] ss:$8 sps:$4 sm:$0xff]  }
 0x462   :  { %2727 = vmatpush1.bf16.msra.mxu0 %v4503_v15 }
 0x463   :  { %2728 = vmatprep.subr.bf16.mxu0 %v4508_v63 }
 0x466   :  { %2729 = vmatpush1.bf16.msra.mxu0 %v4506_v1 }
 0x467   :  { %2730 = vmatprep.subr.bf16.mxu0 %v4511_v3 }
 0x468   :  { %3783 = vmatmul.mubr.msk.bf16.gmra.mrb[12].mxu1 %vm5043_vm10, %v3782_v7  ;;  %v2357_v7 = vld [vmem:[%s5496_s9] sm:$0xf] }
 0x469   :  { %v2362_v13 = vrot.slane %v2357_v7, %v5061_v24  ;;  %v2366_v16 = vrot.slane %v2357_v7, %v5171_v29  ;;  %v2388_v17 = vrot.slane %v2357_v7, %v5067_v26  ;;  %v2392_v18 = vrot.slane %v2357_v7, %v5174_v30 }
 0x46a   :  { %2731 = vmatpush1.bf16.msra.mxu0 %v4509_v5 }
 0x46b   :  { %2913 = vmatprep.subr.bf16.mxu0 %v4514_v6  ;;  %v2372_v8 = vrot.slane %v2362_v13, %v5061_v24  ;;  %v2376_v21 = vrot.slane %v2366_v16, %v5061_v24  ;;  %v2398_v23 = vrot.slane %v2388_v17, %v5067_v26  ;;  %v2402_v27 = vrot.slane %v2392_v18, %v5067_v26 }
 0x533   :  { %v2330_v25 = vpop.f32.mrb[8].mxu1 }
 0x534   :  { %v2377_v31 = vmul.f32 %v2372_v8, %v2330_v25  ;;  %v2332_v11 = vpop.f32.mrb[9].mxu1 }
 0x535   :  { %v2378_v32 = vmul.f32 %v2376_v21, %v2332_v11  ;;  %v2334_v35 = vpop.f32.mrb[10].mxu1 }
 0x536   :  { %v2403_v37 = vadd.f32 %v2398_v23, %v2377_v31  ;;  %v2379_v38 = vmul.f32 %v2372_v8, %v2334_v35  ;;  %v2336_v41 = vpop.f32.mrb[11].mxu1 }
 0x537   :  { %v2404_v42 = vadd.f32 %v2402_v27, %v2378_v32  ;;  %v2380_v43 = vmul.f32 %v2376_v21, %v2336_v41 }
 0x538   :  { %v5328_v52 = vmax.f32 %v2403_v37, 0.0  ;;  %v2405_v57 = vadd.f32 %v2398_v23, %v2379_v38 }
 0x539   :  { %v5330_v2 = vmax.f32 %v2404_v42, 0.0  ;;  %v2406_v36 = vadd.f32 %v2402_v27, %v2380_v43 }
 0x53a   :  { %v2419_v33 = vrot.slane %v5328_v52, 7  ;;  %v5333_v47 = vmax.f32 %v2405_v57, 0.0  ;;  %v2443_v20 = vrot.slane %v5328_v52, 1 }
 0x53b   :  { %v2420_v28 = vrot.slane %v5330_v2, 7  ;;  %v2444_v19 = vrot.slane %v5330_v2, 1  ;;  %v5338_v48 = vmax.f32 %v2406_v36, 0.0  ;;  %v2340_v61 = vpop.f32.mrb[12].mxu1  ;;  %v4512_v36 = vld [vmem:[#allocation10 + $0x100] ss:$8 sps:$4 sm:$0xff]  }
 0x53c   :  { %v2421_v59 = vrot.slane %v5333_v47, 7  ;;  %v2445_v44 = vrot.slane %v5333_v47, 1  ;;  %v2467_v46 = vpack.c.bf16 %v5333_v47, %v5328_v52  ;;  %v2381_v49 = vmul.f32 %v2372_v8, %v2340_v61  ;;  %v2342_v50 = vpop.f32.mrb[13].mxu1  ;;  %v4569_v52 = vld [vmem:[#allocation10 + $0x230] ss:$8 sps:$4 sm:$0xff]  }
 0x53d   :  { %v2422_v51 = vrot.slane %v5338_v48, 7  ;;  %v2446_v53 = vrot.slane %v5338_v48, 1  ;;  %v2382_v54 = vmul.f32 %v2376_v21, %v2342_v50  ;;  %v2344_v55 = vpop.f32.mrb[14].mxu1  ;;  %v2468_v56 = vpack.c.bf16 %v5338_v48, %v5330_v2  ;;  %v4574_v47 = vld [vmem:[#allocation10 + $0x244] ss:$8 sps:$4 sm:$0xff]  }
 0x53e   :  { %v2431_v0 = vsel %vm197_vm0, %v2419_v33, %v2421_v59  ;;  %v5352_v60 = vsel %vm218_vm5, %v2443_v20, %v2445_v44  ;;  %v2407_v58 = vadd.f32 %v2398_v23, %v2381_v49  ;;  %v2383_v9 = vmul.f32 %v2372_v8, %v2344_v55  ;;  %v2346_v10 = vpop.f32.mrb[15].mxu1  ;;  %v4521_v55 = vld [vmem:[#allocation10 + $0x130] ss:$8 sps:$4 sm:$0xff]  }
 0x53f   :  { %v2408_v12 = vadd.f32 %v2402_v27, %v2382_v54  ;;  %v2384_v14 = vmul.f32 %v2376_v21, %v2346_v10  ;;  %v2432_v34 = vsel %vm197_vm0, %v2420_v28, %v2422_v51  ;;  %v5358_v40 = vsel %vm218_vm5, %v2444_v19, %v2446_v53  ;;  %v4523_v54 = vld [vmem:[#allocation10 + $0x134] ss:$8 sps:$4 sm:$0xff]   ;;  %v4532_v10 = vld [vmem:[#allocation10 + $0x164] ss:$8 sps:$4 sm:$0xff]  }
 0x540   :  { %v5360_v15 = vmax.f32 %v2407_v58, 0.0  ;;  %v2409_v63 = vadd.f32 %v2398_v23, %v2383_v9  ;;  %v4529_v58 = vld [vmem:[#allocation10 + $0x154] ss:$8 sps:$4 sm:$0xff]   ;;  %v4527_v9 = vld [vmem:[#allocation10 + $0x150] ss:$8 sps:$4 sm:$0xff]  }
 0x541   :  { %v5362_v1 = vmax.f32 %v2408_v12, 0.0  ;;  %v2410_v3 = vadd.f32 %v2402_v27, %v2384_v14  ;;  %v4530_v12 = vld [vmem:[#allocation10 + $0x160] ss:$8 sps:$4 sm:$0xff]   ;;  %v4535_v14 = vld [vmem:[#allocation10 + $0x174] ss:$8 sps:$4 sm:$0xff]  }
 0x542   :  { %v2423_v5 = vrot.slane %v5360_v15, 7  ;;  %v2447_v6 = vrot.slane %v5360_v15, 1  ;;  %v5366_v7 = vmax.f32 %v2409_v63, 0.0  ;;  %v4541_v63 = vld [vmem:[#allocation10 + $0x194] ss:$8 sps:$4 sm:$0xff]  }
 0x543   :  { %v2424_v13 = vrot.slane %v5362_v1, 7  ;;  %v2448_v16 = vrot.slane %v5362_v1, 1  ;;  %v5370_v17 = vmax.f32 %v2410_v3, 0.0  ;;  %v4539_v3 = vld [vmem:[#allocation10 + $0x190] ss:$8 sps:$4 sm:$0xff]  }
 0x544   :  { %v5374_v18 = vsel %vm218_vm5, %v2445_v44, %v2447_v6  ;;  %v2425_v8 = vrot.slane %v5366_v7, 7  ;;  %v2449_v21 = vrot.slane %v5366_v7, 1  ;;  %v2429_v23 = vsel %vm197_vm0, %v2421_v59, %v2423_v5  ;;  %v4517_v59 = vld [vmem:[#allocation10 + $0x114] ss:$8 sps:$4 sm:$0xff]  }
 0x545   :  { %v3896_v25 = vpack.c.bf16 %v5374_v18, %v5352_v60  ;;  %v2426_v27 = vrot.slane %v5370_v17, 7  ;;  %v2450_v31 = vrot.slane %v5370_v17, 1  ;;  %v2430_v11 = vsel %vm197_vm0, %v2422_v51, %v2424_v13  ;;  %v4610_v60 = vld [vmem:[#allocation11 + $0x48] sm:$0xff]  }
 0x546   :  { %v2433_v32 = vsel %vm197_vm0, %v2425_v8, %v2419_v33  ;;  %v2427_v35 = vsel %vm197_vm0, %v2423_v5, %v2425_v8  ;;  %v2470_v37 = vpack.c.bf16 %v5370_v17, %v5362_v1  ;;  %v2469_v38 = vpack.c.bf16 %v5366_v7, %v5360_v15  ;;  %v4544_v5 = vld [vmem:[#allocation10 + $0x1a4] ss:$8 sps:$4 sm:$0xff]   ;;  %v4577_v1 = vld [vmem:[#allocation10 + $0x254] ss:$8 sps:$4 sm:$0xff]   ;;  %v4575_v17 = vld [vmem:[#allocation10 + $0x250] ss:$8 sps:$4 sm:$0xff]  }
 0x547   :  { %v3820_v41 = vpack.c.bf16 %v2431_v0, %v2433_v32  ;;  %v2434_v42 = vsel %vm197_vm0, %v2426_v27, %v2420_v28  ;;  %v2428_v43 = vsel %vm197_vm0, %v2424_v13, %v2426_v27  ;;  %v3826_v57 = vpack.c.bf16 %v2427_v35, %v2429_v23  ;;  %v4524_v0 = vld [vmem:[#allocation10 + $0x140] ss:$8 sps:$4 sm:$0xff]   ;;  %v4547_v13 = vld [vmem:[#allocation10 + $0x1b4] ss:$8 sps:$4 sm:$0xff]   ;;  %v4550_v8 = vld [vmem:[#allocation10 + $0x1c4] ss:$8 sps:$4 sm:$0xff]  }
 0x548   :  { %v3817_v2 = vpack.c.bf16 %v2432_v34, %v2434_v42  ;;  %v3823_v33 = vpack.c.bf16 %v2428_v43, %v2430_v11  ;;  %v5400_v48 = vsel %vm218_vm5, %v2446_v53, %v2448_v16  ;;  %v5404_v61 = vsel %vm218_vm5, %v2448_v16, %v2450_v31  ;;  %v4538_v34 = vld [vmem:[#allocation10 + $0x184] ss:$8 sps:$4 sm:$0xff]   ;;  %v4545_v16 = vld [vmem:[#allocation10 + $0x1b0] ss:$8 sps:$4 sm:$0xff]   ;;  %v4553_v23 = vld [vmem:[#allocation10 + $0x1d4] ss:$8 sps:$4 sm:$0xff]  }
 0x549   :  { %v3893_v44 = vpack.c.bf16 %v5400_v48, %v5358_v40  ;;  %v5410_v28 = vsel %vm218_vm5, %v2450_v31, %v2444_v19  ;;  %v5414_v49 = vsel %vm218_vm5, %v2447_v6, %v2449_v21  ;;  %v5418_v50 = vsel %vm218_vm5, %v2449_v21, %v2443_v20  ;;  %v4515_v19 = vld [vmem:[#allocation10 + $0x110] ss:$8 sps:$4 sm:$0xff]   ;;  %v4518_v20 = vld [vmem:[#allocation10 + $0x120] ss:$8 sps:$4 sm:$0xff]   ;;  %v4556_v31 = vld [vmem:[#allocation10 + $0x1e4] ss:$8 sps:$4 sm:$0xff]  }
 0x54a   :  { %3818 = vmatprep.mubr.msk.bf16.mxu0 %vm4992_vm3, %v3817_v2  ;;  %v3899_v51 = vpack.c.bf16 %v5410_v28, %v5404_v61  ;;  %v3902_v53 = vpack.c.bf16 %v5418_v50, %v5414_v49  ;;  %v4542_v6 = vld [vmem:[#allocation10 + $0x1a0] ss:$8 sps:$4 sm:$0xff]   ;;  %v4551_v27 = vld [vmem:[#allocation10 + $0x1d0] ss:$8 sps:$4 sm:$0xff]   ;;  %v4559_v32 = vld [vmem:[#allocation10 + $0x1f4] ss:$8 sps:$4 sm:$0xff]  }
 0x54b   :  { %3821 = vmatmul.mubr.msk.bf16.vlgmr.msra.gmra.mrb[12].mxu0 %vm4992_vm3, %v3820_v41  ;;  %v4548_v21 = vld [vmem:[#allocation10 + $0x1c0] ss:$8 sps:$4 sm:$0xff]   ;;  %v4557_v35 = vld [vmem:[#allocation10 + $0x1f0] ss:$8 sps:$4 sm:$0xff]   ;;  %v4562_v41 = vld [vmem:[#allocation10 + $0x204] ss:$8 sps:$4 sm:$0xff]  }
 0x54c   :  { %2914 = vmatpush1.bf16.msra.mxu0 %v4512_v36  ;;  %3824 = vmatprep.mubr.msk.bf16.mxu0 %vm5026_vm8, %v3823_v33  ;;  %v4554_v11 = vld [vmem:[#allocation10 + $0x1e0] ss:$8 sps:$4 sm:$0xff]   ;;  %v4565_v43 = vld [vmem:[#allocation10 + $0x214] ss:$8 sps:$4 sm:$0xff]   ;;  %v4568_v2 = vld [vmem:[#allocation10 + $0x224] ss:$8 sps:$4 sm:$0xff]  }
 0x54d   :  { %2915 = vmatprep.subr.bf16.mxu0 %v4517_v59  ;;  %v4560_v42 = vld [vmem:[#allocation10 + $0x200] ss:$8 sps:$4 sm:$0xff]   ;;  %v4571_v33 = vld [vmem:[#allocation10 + $0x234] ss:$8 sps:$4 sm:$0xff]   ;;  %v4581_v40 = vld [vmem:[#allocation10 + $0x270] ss:$8 sps:$4 sm:$0xff]  }
 0x54e   :  { %v4566_v36 = vld [vmem:[#allocation10 + $0x220] ss:$8 sps:$4 sm:$0xff]   ;;  %v4583_v7 = vld [vmem:[#allocation10 + $0x274] ss:$8 sps:$4 sm:$0xff]  }
 0x54f   :  { %v4578_v15 = vld [vmem:[#allocation10 + $0x260] ss:$8 sps:$4 sm:$0xff]   ;;  %v4589_v59 = vld [vmem:[#allocation10 + $0x294] ss:$8 sps:$4 sm:$0xff]  }
 0x550   :  { %2916 = vmatpush1.bf16.msra.mxu0 %v4515_v19  ;;  %v4584_v48 = vld [vmem:[#allocation10 + $0x280] ss:$8 sps:$4 sm:$0xff]   ;;  %v4592_v19 = vld [vmem:[#allocation10 + $0x2a4] ss:$8 sps:$4 sm:$0xff]   ;;  %v4614_v61 = vld [vmem:[#allocation11 + $0x58] sm:$0xff]  }
 0x551   :  { %2917 = vmatprep.subr.bf16.mxu0 %v4520_v4  ;;  %v4590_v4 = vld [vmem:[#allocation10 + $0x2a0] ss:$8 sps:$4 sm:$0xff]   ;;  %v4615_v28 = vld [vmem:[#allocation11 + $0x18] sm:$0xff]  }
 0x552   :  { %v4611_v18 = vld [vmem:[#allocation11 + $0x8] sm:$0xff]   ;;  %v4616_v49 = vld [vmem:[#allocation11 + $0x60] sm:$0xff]  }
 0x553   :  { %3827 = vmatmul.mubr.msk.bf16.gmra.mrb[16].mxu0 %vm5026_vm8, %v3826_v57  ;;  %v4563_v57 = vld [vmem:[#allocation10 + $0x210] ss:$8 sps:$4 sm:$0xff]   ;;  %v4617_v50 = vld [vmem:[#allocation11 + $0x20] sm:$0xff]  }
 0x554   :  { %2918 = vmatpush1.bf16.msra.mxu0 %v4518_v20  ;;  %2945 = vmatprep.mubr.bf16.mxu0 %v2468_v56  ;;  %v4536_v56 = vld [vmem:[#allocation10 + $0x180] ss:$8 sps:$4 sm:$0xff]   ;;  %v4595_v20 = vld [vmem:[#allocation10 + $0x2b4] ss:$8 sps:$4 sm:$0xff]  }
 0x555   :  { %2919 = vmatprep.subr.bf16.mxu0 %v4523_v54  ;;  %v4593_v54 = vld [vmem:[#allocation10 + $0x2b0] ss:$8 sps:$4 sm:$0xff]  }
 0x558   :  { %2920 = vmatpush1.bf16.msra.mxu0 %v4521_v55  ;;  %v4598_v55 = vld [vmem:[#allocation10 + $0x2c4] ss:$8 sps:$4 sm:$0xff]  }
 0x559   :  { %2921 = vmatprep.subr.bf16.mxu0 %v4526_v22  ;;  %v4596_v22 = vld [vmem:[#allocation10 + $0x2c0] ss:$8 sps:$4 sm:$0xff]  }
 0x55c   :  { %2922 = vmatpush1.bf16.msra.mxu0 %v4524_v0  ;;  %v4601_v0 = vld [vmem:[#allocation10 + $0x2d4] ss:$8 sps:$4 sm:$0xff]  }
 0x55d   :  { %2923 = vmatprep.subr.bf16.mxu0 %v4529_v58  ;;  %v4599_v58 = vld [vmem:[#allocation10 + $0x2d0] ss:$8 sps:$4 sm:$0xff]  }
 0x560   :  { %2924 = vmatpush1.bf16.msra.mxu0 %v4527_v9  ;;  %v4604_v9 = vld [vmem:[#allocation10 + $0x2e4] ss:$8 sps:$4 sm:$0xff]  }
 0x561   :  { %2925 = vmatprep.subr.bf16.mxu0 %v4532_v10  ;;  %v4602_v10 = vld [vmem:[#allocation10 + $0x2e0] ss:$8 sps:$4 sm:$0xff]  }
 0x564   :  { %2926 = vmatpush1.bf16.msra.mxu0 %v4530_v12  ;;  %v4607_v12 = vld [vmem:[#allocation10 + $0x2f4] ss:$8 sps:$4 sm:$0xff]  }
 0x565   :  { %2927 = vmatprep.subr.bf16.mxu0 %v4535_v14  ;;  %v4605_v14 = vld [vmem:[#allocation10 + $0x2f0] ss:$8 sps:$4 sm:$0xff]  }
 0x568   :  { %2928 = vmatpush1.bf16.msra.mxu0 %v4533_v45  ;;  %v4608_v45 = vld [vmem:[#allocation11 + $0x40] sm:$0xff]  }
 0x569   :  { %2929 = vmatprep.subr.bf16.mxu0 %v4538_v34  ;;  %v4609_v34 = vld [vmem:[#allocation11] sm:$0xff]   ;;  %3981 = vmatprep.subr.bf16.mxu1 %v4608_v45 }
 0x56a   :  { %3982 = vmatpush3.bf16.msra.mxu1 %v4609_v34 }
 0x56b   :  { %3983 = vmatprep.subr.bf16.mxu1 %v4610_v60 }
 0x56c   :  { %2930 = vmatpush1.bf16.msra.mxu0 %v4536_v56  ;;  %v4621_v56 = vld [vmem:[#allocation11 + $0x30] sm:$0xff]  }
 0x56d   :  { %2931 = vmatprep.subr.bf16.mxu0 %v4541_v63  ;;  %v4622_v63 = vld [vmem:[#allocation11 + $0x78] sm:$0xff]  }
 0x56e   :  { %3984 = vmatpush3.bf16.msra.mxu1 %v4611_v18 }
 0x56f   :  { %3985 = vmatprep.subr.bf16.mxu1 %v4612_v39 }
 0x570   :  { %2932 = vmatpush1.bf16.msra.mxu0 %v4539_v3  ;;  %v4623_v3 = vld [vmem:[#allocation11 + $0x38] sm:$0xff]  }
 0x571   :  { %2933 = vmatprep.subr.bf16.mxu0 %v4544_v5  ;;  %v3224_v5 = vld [vmem:[%s5497_s10] sm:$0xf] }
 0x574   :  { %2934 = vmatpush1.bf16.msra.mxu0 %v4542_v6  ;;  %v3229_v6 = vrot.slane %v3224_v5, %v5061_v24 }
 0x575   :  { %2935 = vmatprep.subr.bf16.mxu0 %v4547_v13  ;;  %v3233_v13 = vrot.slane %v3224_v5, %v5171_v29 }
 0x578   :  { %2936 = vmatpush1.bf16.msra.mxu0 %v4545_v16  ;;  %v3255_v16 = vrot.slane %v3224_v5, %v5067_v26 }
 0x579   :  { %2937 = vmatprep.subr.bf16.mxu0 %v4550_v8  ;;  %v3259_v8 = vrot.slane %v3224_v5, %v5174_v30 }
 0x57c   :  { %2938 = vmatpush1.bf16.msra.mxu0 %v4548_v21  ;;  %v3239_v21 = vrot.slane %v3229_v6, %v5061_v24 }
 0x57d   :  { %2939 = vmatprep.subr.bf16.mxu0 %v4553_v23  ;;  %v3243_v23 = vrot.slane %v3233_v13, %v5061_v24 }
 0x580   :  { %2940 = vmatpush1.bf16.msra.mxu0 %v4551_v27  ;;  %v3265_v27 = vrot.slane %v3255_v16, %v5067_v26 }
 0x581   :  { %2941 = vmatprep.subr.bf16.mxu0 %v4556_v31 }
 0x584   :  { %2942 = vmatpush1.bf16.msra.mxu0 %v4554_v11  ;;  %v3269_v11 = vrot.slane %v3259_v8, %v5067_v26 }
 0x585   :  { %2943 = vmatprep.subr.bf16.mxu0 %v4559_v32 }
 0x588   :  { %2944 = vmatpush1.bf16.msra.mxu0 %v4557_v35 }
 0x589   :  { %3163 = vmatprep.subr.bf16.mxu0 %v4562_v41 }
 0x58b   :  { %2946 = vmatmul.mubr.bf16.vlgmr.msra.gmra.mrb[12].mxu0 %v2467_v46  ;;  %v4572_v46 = vld [vmem:[#allocation10 + $0x240] ss:$8 sps:$4 sm:$0xff]  }
 0x58c   :  { %2955 = vmatprep.mubr.bf16.mxu0 %v2470_v37  ;;  %3164 = vmatpush1.bf16.msra.mxu0 %v4560_v42  ;;  %v4580_v37 = vld [vmem:[#allocation10 + $0x264] ss:$8 sps:$4 sm:$0xff]  }
 0x58d   :  { %3165 = vmatprep.subr.bf16.mxu0 %v4565_v43 }
 0x590   :  { %3166 = vmatpush1.bf16.msra.mxu0 %v4563_v57 }
 0x591   :  { %3167 = vmatprep.subr.bf16.mxu0 %v4568_v2 }
 0x593   :  { %2956 = vmatmul.mubr.bf16.gmra.mrb[16].mxu0 %v2469_v38  ;;  %v4586_v38 = vld [vmem:[#allocation10 + $0x284] ss:$8 sps:$4 sm:$0xff]  }
 0x594   :  { %3168 = vmatpush1.bf16.msra.mxu0 %v4566_v36  ;;  %3894 = vmatprep.mubr.msk.bf16.mxu0 %vm5011_vm7, %v3893_v44  ;;  %v4587_v44 = vld [vmem:[#allocation10 + $0x290] ss:$8 sps:$4 sm:$0xff]  }
 0x595   :  { %3169 = vmatprep.subr.bf16.mxu0 %v4571_v33 }
 0x598   :  { %3170 = vmatpush1.bf16.msra.mxu0 %v4569_v52 }
 0x599   :  { %3171 = vmatprep.subr.bf16.mxu0 %v4574_v47 }
 0x59c   :  { %3172 = vmatpush1.bf16.msra.mxu0 %v4572_v46 }
 0x59d   :  { %3173 = vmatprep.subr.bf16.mxu0 %v4577_v1 }
 0x5a0   :  { %3174 = vmatpush1.bf16.msra.mxu0 %v4575_v17 }
 0x5a1   :  { %3175 = vmatprep.subr.bf16.mxu0 %v4580_v37 }
 0x5a4   :  { %3176 = vmatpush1.bf16.msra.mxu0 %v4578_v15 }
 0x5a5   :  { %3177 = vmatprep.subr.bf16.mxu0 %v4583_v7 }
 0x5a8   :  { %3178 = vmatpush1.bf16.msra.mxu0 %v4581_v40 }
 0x5a9   :  { %3179 = vmatprep.subr.bf16.mxu0 %v4586_v38 }
 0x5ac   :  { %3180 = vmatpush1.bf16.msra.mxu0 %v4584_v48 }
 0x5ad   :  { %3181 = vmatprep.subr.bf16.mxu0 %v4589_v59 }
 0x5b0   :  { %3182 = vmatpush1.bf16.msra.mxu0 %v4587_v44 }
 0x5b1   :  { %3183 = vmatprep.subr.bf16.mxu0 %v4592_v19 }
 0x5b4   :  { %3184 = vmatpush1.bf16.msra.mxu0 %v4590_v4 }
 0x5b5   :  { %3185 = vmatprep.subr.bf16.mxu0 %v4595_v20 }
 0x5b8   :  { %3186 = vmatpush1.bf16.msra.mxu0 %v4593_v54 }
 0x5b9   :  { %3187 = vmatprep.subr.bf16.mxu0 %v4598_v55 }
 0x5bc   :  { %3188 = vmatpush1.bf16.msra.mxu0 %v4596_v22 }
 0x5bd   :  { %3189 = vmatprep.subr.bf16.mxu0 %v4601_v0 }
 0x5c0   :  { %3190 = vmatpush1.bf16.msra.mxu0 %v4599_v58 }
 0x5c1   :  { %3191 = vmatprep.subr.bf16.mxu0 %v4604_v9 }
 0x5c4   :  { %3192 = vmatpush1.bf16.msra.mxu0 %v4602_v10 }
 0x5c5   :  { %3193 = vmatprep.subr.bf16.mxu0 %v4607_v12 }
 0x5c8   :  { %3194 = vmatpush1.bf16.msra.mxu0 %v4605_v14 }
 0x5cb   :  { %3897 = vmatmul.mubr.msk.bf16.vlgmr.msra.gmra.mrb[12].mxu0 %vm5011_vm7, %v3896_v25  ;;  %v4613_v25 = vld [vmem:[#allocation11 + $0x10] sm:$0xff]  }
 0x5cc   :  { %3900 = vmatprep.mubr.msk.bf16.mxu0 %vm5043_vm10, %v3899_v51  ;;  %3986 = vmatpush3.bf16.msra.mxu1 %v4613_v25  ;;  %v4619_v51 = vld [vmem:[#allocation11 + $0x28] sm:$0xff]  }
 0x5cd   :  { %3987 = vmatprep.subr.bf16.mxu1 %v4614_v61 }
 0x5d0   :  { %3988 = vmatpush3.bf16.msra.mxu1 %v4615_v28 }
 0x5d1   :  { %3989 = vmatprep.subr.bf16.mxu1 %v4616_v49 }
 0x5d3   :  { %3903 = vmatmul.mubr.msk.bf16.gmra.mrb[16].mxu0 %vm5043_vm10, %v3902_v53  ;;  %v4620_v53 = vld [vmem:[#allocation11 + $0x70] sm:$0xff]  }
 0x5d4   :  { %3990 = vmatpush3.bf16.msra.mxu1 %v4617_v50 }
 0x5d5   :  { %3991 = vmatprep.subr.bf16.mxu1 %v4618_v62 }
 0x5d8   :  { %3992 = vmatpush3.bf16.msra.mxu1 %v4619_v51 }
 0x5d9   :  { %3993 = vmatprep.subr.bf16.mxu1 %v4620_v53 }
 0x5dc   :  { %3994 = vmatpush3.bf16.msra.mxu1 %v4621_v56 }
 0x5dd   :  { %3995 = vmatprep.subr.bf16.mxu1 %v4622_v63 }
 0x5e0   :  { %3996 = vmatpush3.bf16.msra.mxu1 %v4623_v3 }
 0x69e   :  { %v3197_v31 = vpop.f32.mrb[12].mxu0 }
 0x69f   :  { %v3244_v32 = vmul.f32 %v3239_v21, %v3197_v31  ;;  %v3199_v35 = vpop.f32.mrb[13].mxu0 }
 0x6a0   :  { %v3245_v41 = vmul.f32 %v3243_v23, %v3199_v35  ;;  %v3201_v42 = vpop.f32.mrb[14].mxu0 }
 0x6a1   :  { %v3270_v43 = vadd.f32 %v3265_v27, %v3244_v32  ;;  %v3246_v57 = vmul.f32 %v3239_v21, %v3201_v42  ;;  %v3203_v29 = vpop.f32.mrb[15].mxu0 }
 0x6a2   :  { %v3271_v2 = vadd.f32 %v3269_v11, %v3245_v41  ;;  %v3247_v36 = vmul.f32 %v3243_v23, %v3203_v29 }
 0x6a3   :  { %v3272_v33 = vadd.f32 %v3265_v27, %v3246_v57  ;;  %v3278_v52 = vmax.f32 %v3270_v43, 0.0 }
 0x6a4   :  { %v3273_v30 = vadd.f32 %v3269_v11, %v3247_v36  ;;  %v3279_v46 = vmax.f32 %v3271_v2, 0.0 }
 0x6a5   :  { %v3280_v47 = vmax.f32 %v3272_v33, 0.0 }
 0x6a6   :  { %v3281_v24 = vmax.f32 %v3273_v30, 0.0  ;;  %v3207_v1 = vpop.f32.mrb[16].mxu0 }
 0x6a7   :  { %v3286_v17 = vadd.f32 %v3280_v47, %v3278_v52  ;;  %v3248_v37 = vmul.f32 %v3239_v21, %v3207_v1  ;;  %v3209_v15 = vpop.f32.mrb[17].mxu0  ;;  %v3904_v47 = vld [vmem:[%s5499_s12] ss:$0 sm:$0xff] }
 0x6a8   :  { %v3293_v26 = vadd.f32 %v3281_v24, %v3279_v46  ;;  %v3249_v7 = vmul.f32 %v3243_v23, %v3209_v15  ;;  %v3211_v40 = vpop.f32.mrb[18].mxu0 }
 0x6a9   :  { %v3287_v38 = vrot.slane %v3286_v17, 4  ;;  %v3274_v48 = vadd.f32 %v3265_v27, %v3248_v37  ;;  %v3250_v59 = vmul.f32 %v3239_v21, %v3211_v40  ;;  %v3213_v44 = vpop.f32.mrb[19].mxu0 }
 0x6aa   :  { %v3294_v19 = vrot.slane %v3293_v26, 4  ;;  %v3275_v4 = vadd.f32 %v3269_v11, %v3249_v7  ;;  %v3251_v20 = vmul.f32 %v3243_v23, %v3213_v44 }
 0x6ab   :  { %v3288_v54 = vadd.f32 %v3287_v38, %v3286_v17  ;;  %v3276_v55 = vadd.f32 %v3265_v27, %v3250_v59  ;;  %v3282_v9 = vmax.f32 %v3274_v48, 0.0 }
 0x6ac   :  { %v3295_v22 = vadd.f32 %v3294_v19, %v3293_v26  ;;  %v3277_v0 = vadd.f32 %v3269_v11, %v3251_v20  ;;  %v3283_v14 = vmax.f32 %v3275_v4, 0.0 }
 0x6ad   :  { %v3289_v58 = vrot.slane %v3288_v54, 2  ;;  %v3284_v10 = vmax.f32 %v3276_v55, 0.0 }
 0x6ae   :  { %v3296_v12 = vrot.slane %v3295_v22, 2  ;;  %v3285_v45 = vmax.f32 %v3277_v0, 0.0 }
 0x6af   :  { %v3290_v34 = vadd.f32 %v3289_v58, %v3288_v54  ;;  %v3300_v60 = vadd.f32 %v3284_v10, %v3282_v9 }
 0x6b0   :  { %v3297_v18 = vadd.f32 %v3296_v12, %v3295_v22  ;;  %v3307_v39 = vadd.f32 %v3285_v45, %v3283_v14 }
 0x6b1   :  { %v3291_v25 = vrot.slane %v3290_v34, 1  ;;  %v3301_v61 = vrot.slane %v3300_v60, 4 }
 0x6b2   :  { %v3298_v28 = vrot.slane %v3297_v18, 1  ;;  %v3308_v49 = vrot.slane %v3307_v39, 4 }
 0x6b3   :  { %v3302_v50 = vadd.f32 %v3301_v61, %v3300_v60  ;;  %v3292_v51 = vadd.f32 %v3291_v25, %v3290_v34 }
 0x6b4   :  { %v3309_v62 = vadd.f32 %v3308_v49, %v3307_v39  ;;  %v3299_v63 = vadd.f32 %v3298_v28, %v3297_v18 }
 0x6b5   :  { %v3303_v53 = vrot.slane %v3302_v50, 2  ;;  %v3315_v6 = vmul.f32 0.0625, %v3292_v51 }
 0x6b6   :  { %v3310_v56 = vrot.slane %v3309_v62, 2  ;;  %v3316_v8 = vmul.f32 0.0625, %v3299_v63 }
 0x6b7   :  { %v3304_v3 = vadd.f32 %v3303_v53, %v3302_v50  ;;  %v3319_v27 = vpack.c.bf16 %v3315_v6, %v3315_v6 }
 0x6b8   :  { %v3311_v5 = vadd.f32 %v3310_v56, %v3309_v62  ;;  %v3320_v32 = vpack.c.bf16 %v3316_v8, %v3316_v8 }
 0x6b9   :  { %v3305_v13 = vrot.slane %v3304_v3, 1  ;;  %v3366_v42 = vunpack.c.l.b16 %v3319_v27 }
 0x6ba   :  { %v3312_v16 = vrot.slane %v3311_v5, 1  ;;  %v3367_v57 = vunpack.c.l.b16 %v3320_v32 }
 0x6bb   :  { %v3306_v21 = vadd.f32 %v3305_v13, %v3304_v3 }
 0x6bc   :  { %v3313_v23 = vadd.f32 %v3312_v16, %v3311_v5 }
 0x6bd   :  { %v3317_v31 = vmul.f32 0.0625, %v3306_v21 }
 0x6be   :  { %v3318_v11 = vmul.f32 0.0625, %v3313_v23 }
 0x6bf   :  { %v3321_v35 = vpack.c.bf16 %v3317_v31, %v3317_v31 }
 0x6c0   :  { %v3322_v41 = vpack.c.bf16 %v3318_v11, %v3318_v11 }
 0x6c1   :  { %v3368_v43 = vunpack.c.l.b16 %v3321_v35 }
 0x6c2   :  { %v3369_v29 = vunpack.c.l.b16 %v3322_v41 }
 0x6c3   :  { %v3371_v2 = vsel %vm3370_vm11, %v3368_v43, %v3366_v42 }
 0x6c4   :  { %v3372_v36 = vsel %vm3370_vm11, %v3369_v29, %v3367_v57  ;;  %v3373_v30 = vpack.c.b16 %v3371_v2, %v3371_v2 }
 0x6c5   :  { %v3374_v33 = vpack.c.b16 %v3372_v36, %v3372_v36 }
 0x6c7   :  { %3505 = vmatprep.mubr.bf16.mxu1 %v3374_v33 }
 0x6c8   :  { %3506 = vmatmul.mubr.bf16.vlgmr.msra.gmra.mrb[16].mxu1 %v3373_v30 }
 0x79b   :  { %v3997_v52 = vpop.f32.mrb[16].mxu1 }
 0x79c   :  { %v3998_v46 = vpop.f32.mrb[17].mxu1 }
 0x79d   :  { %v3999_v24 = vadd.f32 %v3998_v46, %v3997_v52  ;;  %v4000_v1 = vpop.f32.mrb[18].mxu1 }
 0x79e   :  { %v4001_v17 = vpop.f32.mrb[19].mxu1 }
 0x79f   :  { %v3508_v37 = vadd.f32 %v3999_v24, %v3904_v47 }
 0x7a1   :  { %3513 = vst [vmem:[#allocation13] sm:$0x3] %v3508_v37 }
 0x7a2   :  { %4767 = shalt.err (!%p4764_p10)
}
 0x7a3   :  { %s4768_s12 = scalar_lea.hbm %s5500_s13, 32 }
 0x7a4   :  { %p4769_p11 = scmp.ne.s32.totalorder %s5500_s13, %s4768_s12  ;;  %p4772_p12 = scmp.lt.u32.totalorder %s4768_s12, %s5500_s13 }
 0x7a6   :  { %p4774_p13 = pnand %p4772_p12, %p4769_p11 }
 0x7a8   :  { %4777 = shalt.err (!%p4774_p13)
}
 0x7a9   :  { %3523 = dma.vmem_to_hbm [thread:$0]  %s3521_s25, 32, %s5500_s13, [#allocation4]  }
 0x7aa   :  { %4786 = dma.done.wait [#allocation4], 32  }
 0x7ab   :  { %4787 = vsyncadd [#allocation4], 4294967264 }
 0x7ac   :  { %3527 = vsyncpa [#allocation3], 1 }
 0x7ad   :  { %3528 = vsyncpa [#allocation6], 1 }
 0x7ae   :  { %3529 = vsyncpa [#allocation9], 1 }
 0x7af   :  { %3530 = vsyncpa [#allocation12], 1 }
 0x7b0   :  { %3531 = vsyncpa [#allocation4], 1 }

</bundles_post_ra>
